<compile_context>
chip_gen: v7x
topology: tpu7x:2x2x1
jax: 0.10.0
libtpu: 0.0.40
codegen_flags: <defaults>
</compile_context>

<pallas_src>
import functools
import math

import jax
import jax.numpy as jnp
from jax.experimental import pallas as pl
from jax.experimental.pallas import tpu as pltpu


# ------------------------------ Fused LSTM kernel ------------------------------
def _fused_lstm_kernel(*refs, num_layers, hidden_size, seq_len, batch_size):
    L, H, S, B = num_layers, hidden_size, seq_len, batch_size
    x_ref = refs[0]                                   # (S*B, D0)
    layer_w = [(refs[1 + 3 * l], refs[2 + 3 * l], refs[3 + 3 * l])
               for l in range(L)]
    base = 1 + 3 * L
    (h0_ref, c0_ref, wlin_ref, blin_ref, y_ref,
     seq_scr, pg_scr, h_scr, c_scr) = refs[base:base + 9]

    # PyTorch gate order along the 4H axis: i, f, g, o.
    # Single-tanh gate formulation: sigmoid(x) = 0.5 * tanh(0.5 * x) + 0.5.
    # tanh-lanes (the "g" quadrant) use scale 1 / offset 0; sigmoid-lanes use
    # 0.5 / 0.5.  Constants hoisted out of all loops (JAX does not CSE
    # broadcast_in_dim).
    lane = jax.lax.broadcasted_iota(jnp.int32, (B, 4 * H), 1)
    g_lanes = (lane >= 2 * H) & (lane < 3 * H)
    gate_scale = jnp.where(g_lanes, 1.0, 0.5).astype(jnp.float32)
    gate_off = jnp.where(g_lanes, 0.0, 0.5).astype(jnp.float32)

    for l in range(L):
        wih_ref, whh_ref, b_ref = layer_w[l]
        whh = whh_ref[...]           # (H, 4H)

        # ---- Hoisted input projection: ONE batched matmul per layer over the
        #      whole sequence, plus one bias add, parked in VMEM. ----
        x_all = x_ref[...] if l == 0 else seq_scr[...]        # (S*B, D_l)
        pg_scr[...] = (jnp.dot(x_all, wih_ref[...],
                               preferred_element_type=jnp.float32)
                       + b_ref[...])

        h_scr[...] = h0_ref[l]
        c_scr[...] = c0_ref[l]

        # ---- Recurrence: only h @ W_hh + gate math on the serial critical
        #      path.  Fully unrolled over the small static sequence length.
        #      TODO(synk): pltpu.matmul_push_rhs/acc_lhs to pin W_hh in the MXU
        #      weight registers across steps at realistic H. ----
        last_layer = (l == L - 1)
        for t in range(S):
            row = t * B
            gates = pg_scr[pl.ds(row, B), :] + jnp.dot(
                h_scr[...], whh, preferred_element_type=jnp.float32)
            act = jnp.tanh(gates * gate_scale) * gate_scale + gate_off
            i_g = act[:, 0:H]
            f_g = act[:, H:2 * H]
            g_g = act[:, 2 * H:3 * H]
            o_g = act[:, 3 * H:4 * H]
            c_new = f_g * c_scr[...] + i_g * g_g
            h_new = o_g * jnp.tanh(c_new)
            c_scr[...] = c_new
            h_scr[...] = h_new
            if not last_layer:
                seq_scr[pl.ds(row, B), :] = h_new   # next layer's input (VMEM)

    # ---- Fused final linear head on the last layer's last hidden state. ----
    y_ref[...] = (jnp.dot(h_scr[...], wlin_ref[...],
                          preferred_element_type=jnp.float32) + blin_ref[...])


def lstm_forward(params, x, h0, c0, num_layers, hidden_size):
    """x: (S, B, input_size); h0/c0: (num_layers, B, H). Returns (B*output_size,)."""
    S, B, D = x.shape
    H = hidden_size
    L = num_layers
    O = params["w_lin"].shape[1]
    SB = S * B

    # Time-major flatten: row s*B + b corresponds to (time s, batch b).
    x2 = x.reshape(SB, D)

    inputs = [x2]
    in_specs = [pl.BlockSpec((SB, D), lambda i: (0, 0))]
    for l in range(L):
        wih = params[f"w_ih_{l}"]
        whh = params[f"w_hh_{l}"]
        b = params[f"b_{l}"]
        inputs += [wih, whh, b]
        in_specs += [
            pl.BlockSpec(wih.shape, lambda i: (0, 0)),
            pl.BlockSpec(whh.shape, lambda i: (0, 0)),
            pl.BlockSpec(b.shape, lambda i: (0, 0)),
        ]
    inputs += [h0, c0, params["w_lin"], params["b_lin"]]
    in_specs += [
        pl.BlockSpec((L, B, H), lambda i: (0, 0, 0)),
        pl.BlockSpec((L, B, H), lambda i: (0, 0, 0)),
        pl.BlockSpec((H, O), lambda i: (0, 0)),
        pl.BlockSpec((1, O), lambda i: (0, 0)),
    ]

    kernel = functools.partial(_fused_lstm_kernel, num_layers=L,
                               hidden_size=H, seq_len=S, batch_size=B)
    y = pl.pallas_call(
        kernel,
        out_shape=jax.ShapeDtypeStruct((B, O), jnp.float32),
        grid_spec=pltpu.PrefetchScalarGridSpec(
            num_scalar_prefetch=0,
            grid=(1,),
            in_specs=in_specs,
            out_specs=pl.BlockSpec((B, O), lambda i: (0, 0)),
            scratch_shapes=[
                pltpu.VMEM((SB, H), jnp.float32),        # per-layer h sequence
                pltpu.VMEM((SB, 4 * H), jnp.float32),    # hoisted pre-gates
                pltpu.VMEM((B, H), jnp.float32),         # h state
                pltpu.VMEM((B, H), jnp.float32),         # c state
            ],
        ),
        compiler_params=pltpu.CompilerParams(
            dimension_semantics=("arbitrary",)),
    )(*inputs)
    return y.reshape(-1)


# ------------------------------ Parameter init --------------------------------
def init_params(key, input_size, hidden_size, num_layers, output_size):
    """Deterministic init mirroring PyTorch's default U(-1/sqrt(H), 1/sqrt(H))."""
    stdv = 1.0 / math.sqrt(hidden_size)
    params = {}
    in_dims = [input_size] + [hidden_size] * (num_layers - 1)
    keys = jax.random.split(key, num_layers * 4 + 2)
    k = 0
    for l in range(num_layers):
        d = in_dims[l]
        # stored pre-transposed: (in, 4H) and (H, 4H); bias = b_ih + b_hh
        params[f"w_ih_{l}"] = jax.random.uniform(
            keys[k], (d, 4 * hidden_size), jnp.float32, -stdv, stdv); k += 1
        params[f"w_hh_{l}"] = jax.random.uniform(
            keys[k], (hidden_size, 4 * hidden_size), jnp.float32, -stdv, stdv); k += 1
        b_ih = jax.random.uniform(
            keys[k], (4 * hidden_size,), jnp.float32, -stdv, stdv); k += 1
        b_hh = jax.random.uniform(
            keys[k], (4 * hidden_size,), jnp.float32, -stdv, stdv); k += 1
        params[f"b_{l}"] = (b_ih + b_hh).reshape(1, 4 * hidden_size)
    lin_stdv = 1.0 / math.sqrt(hidden_size)
    params["w_lin"] = jax.random.uniform(
        keys[k], (hidden_size, output_size), jnp.float32, -lin_stdv, lin_stdv); k += 1
    params["b_lin"] = jax.random.uniform(
        keys[k], (1, output_size), jnp.float32, -lin_stdv, lin_stdv)
    return params


# ------------------------------ Pure-JAX reference ----------------------------
def _lstm_forward_ref(params, x, h0, c0, num_layers, hidden_size):
    h_seq = x
    for l in range(num_layers):
        def step(carry, x_t, l=l):
            h, c = carry
            gates = (x_t @ params[f"w_ih_{l}"] + h @ params[f"w_hh_{l}"]
                     + params[f"b_{l}"])
            H = hidden_size
            i = jax.nn.sigmoid(gates[:, 0:H])
            f = jax.nn.sigmoid(gates[:, H:2 * H])
            g = jnp.tanh(gates[:, 2 * H:3 * H])
            o = jax.nn.sigmoid(gates[:, 3 * H:4 * H])
            c = f * c + i * g
            h = o * jnp.tanh(c)
            return (h, c), h
        _, h_seq = jax.lax.scan(step, (h0[l], c0[l]), h_seq)
    return (h_seq[-1] @ params["w_lin"] + params["b_lin"]).reshape(-1)


if __name__ == "__main__":
    input_size, hidden_size, sequence_len = 8, 32, 8
    batch_size, output_size, num_layers = 2, 1, 2

    key = jax.random.PRNGKey(0)
    k_param, k_x, k_h, k_c = jax.random.split(key, 4)

    params = init_params(k_param, input_size, hidden_size, num_layers, output_size)
    x = jax.random.normal(k_x, (sequence_len, batch_size, input_size), jnp.float32)
    # mirrors init_hidden(): random initial hidden/cell state (deterministic here)
    h0 = jax.random.normal(k_h, (num_layers, batch_size, hidden_size), jnp.float32)
    c0 = jax.random.normal(k_c, (num_layers, batch_size, hidden_size), jnp.float32)

    y = lstm_forward(params, x, h0, c0, num_layers, hidden_size)
    y = jax.block_until_ready(y)

    y_ref = _lstm_forward_ref(params, x, h0, c0, num_layers, hidden_size)
    assert y.shape == (batch_size * output_size,)
    assert jnp.allclose(y, y_ref, rtol=1e-3, atol=1e-3), (y, y_ref)

    print("KERNEL_OK")
</pallas_src>

<mosaic_0001>
module attributes {stable_mosaic.version = 11 : i64} {
  func.func @_fused_lstm_kernel(%arg0: i32, %arg1: memref<16x8xf32, #tpu.memory_space<vmem>>, %arg2: memref<8x128xf32, #tpu.memory_space<vmem>>, %arg3: memref<32x128xf32, #tpu.memory_space<vmem>>, %arg4: memref<1x128xf32, #tpu.memory_space<vmem>>, %arg5: memref<32x128xf32, #tpu.memory_space<vmem>>, %arg6: memref<32x128xf32, #tpu.memory_space<vmem>>, %arg7: memref<1x128xf32, #tpu.memory_space<vmem>>, %arg8: memref<2x2x32xf32, #tpu.memory_space<vmem>>, %arg9: memref<2x2x32xf32, #tpu.memory_space<vmem>>, %arg10: memref<32x1xf32, #tpu.memory_space<vmem>>, %arg11: memref<1x1xf32, #tpu.memory_space<vmem>>, %arg12: memref<2x1xf32, #tpu.memory_space<vmem>>, %arg13: memref<16x32xf32, #tpu.memory_space<vmem>>, %arg14: memref<16x128xf32, #tpu.memory_space<vmem>>, %arg15: memref<2x32xf32, #tpu.memory_space<vmem>>, %arg16: memref<2x32xf32, #tpu.memory_space<vmem>>) attributes {dimension_semantics = [#tpu.dimension_semantics<arbitrary>], iteration_bounds = array<i64: 1>, scalar_prefetch = 0 : i64, scratch_operands = 4 : i64, tpu.core_type = #tpu.core_type<tc>, window_params = [{pipeline_mode = #tpu.pipeline_mode<synchronous>, transform_indices = @transform_0, window_bounds = array<i64: 16, 8>}, {pipeline_mode = #tpu.pipeline_mode<synchronous>, transform_indices = @transform_1, window_bounds = array<i64: 8, 128>}, {pipeline_mode = #tpu.pipeline_mode<synchronous>, transform_indices = @transform_2, window_bounds = array<i64: 32, 128>}, {pipeline_mode = #tpu.pipeline_mode<synchronous>, transform_indices = @transform_3, window_bounds = array<i64: 1, 128>}, {pipeline_mode = #tpu.pipeline_mode<synchronous>, transform_indices = @transform_4, window_bounds = array<i64: 32, 128>}, {pipeline_mode = #tpu.pipeline_mode<synchronous>, transform_indices = @transform_5, window_bounds = array<i64: 32, 128>}, {pipeline_mode = #tpu.pipeline_mode<synchronous>, transform_indices = @transform_6, window_bounds = array<i64: 1, 128>}, {pipeline_mode = #tpu.pipeline_mode<synchronous>, transform_indices = @transform_7, window_bounds = array<i64: 2, 2, 32>}, {pipeline_mode = #tpu.pipeline_mode<synchronous>, transform_indices = @transform_8, window_bounds = array<i64: 2, 2, 32>}, {pipeline_mode = #tpu.pipeline_mode<synchronous>, transform_indices = @transform_9, window_bounds = array<i64: 32, 1>}, {pipeline_mode = #tpu.pipeline_mode<synchronous>, transform_indices = @transform_10, window_bounds = array<i64: 1, 1>}, {pipeline_mode = #tpu.pipeline_mode<synchronous>, transform_indices = @transform_11, window_bounds = array<i64: 2, 1>}]} {
    %0 = tpu.iota {dimensions = array<i32: 1>} : vector<2x128xi32>
    %c64_i32 = arith.constant 64 : i32
    %1 = vector.broadcast %c64_i32 : i32 to vector<2x128xi32>
    %2 = arith.cmpi sge, %0, %1 : vector<2x128xi32>
    %c96_i32 = arith.constant 96 : i32
    %3 = vector.broadcast %c96_i32 : i32 to vector<2x128xi32>
    %4 = arith.cmpi slt, %0, %3 : vector<2x128xi32>
    %5 = arith.andi %2, %4 : vector<2x128xi1>
    %cst = arith.constant 1.000000e+00 : f32
    %cst_0 = arith.constant 5.000000e-01 : f32
    %6 = vector.broadcast %cst : f32 to vector<2x128xf32>
    %7 = vector.broadcast %cst_0 : f32 to vector<2x128xf32>
    %8 = arith.select %5, %6, %7 : vector<2x128xi1>, vector<2x128xf32>
    %cst_1 = arith.constant 0.000000e+00 : f32
    %cst_2 = arith.constant 5.000000e-01 : f32
    %9 = vector.broadcast %cst_1 : f32 to vector<2x128xf32>
    %10 = vector.broadcast %cst_2 : f32 to vector<2x128xf32>
    %11 = arith.select %5, %9, %10 : vector<2x128xi1>, vector<2x128xf32>
    %c0 = arith.constant 0 : index
    %c0_3 = arith.constant 0 : index
    %12 = vector.load %arg3[%c0, %c0_3] : memref<32x128xf32, #tpu.memory_space<vmem>>, vector<32x128xf32>
    %c0_4 = arith.constant 0 : index
    %c0_5 = arith.constant 0 : index
    %13 = vector.load %arg1[%c0_4, %c0_5] : memref<16x8xf32, #tpu.memory_space<vmem>>, vector<16x8xf32>
    %c0_6 = arith.constant 0 : index
    %c0_7 = arith.constant 0 : index
    %14 = vector.load %arg2[%c0_6, %c0_7] : memref<8x128xf32, #tpu.memory_space<vmem>>, vector<8x128xf32>
    %cst_8 = arith.constant dense<0.000000e+00> : vector<16x128xf32>
    %15 = tpu.matmul %13, %14, %cst_8 {dimension_numbers = #tpu.dot_dimension_numbers<[1], [0], [0], [1], [0, 0, 1, 1], [], []>} : vector<16x8xf32>, vector<8x128xf32>, vector<16x128xf32> -> vector<16x128xf32>
    %c0_9 = arith.constant 0 : index
    %c0_10 = arith.constant 0 : index
    %16 = vector.load %arg4[%c0_9, %c0_10] : memref<1x128xf32, #tpu.memory_space<vmem>>, vector<1x128xf32>
    %17 = vector.broadcast %16 : vector<1x128xf32> to vector<16x128xf32>
    %18 = arith.addf %15, %17 : vector<16x128xf32>
    %c0_11 = arith.constant 0 : index
    %c0_12 = arith.constant 0 : index
    %19 = vector.load %arg14[%c0_11, %c0_12] : memref<16x128xf32, #tpu.memory_space<vmem>>, vector<16x128xf32>
    tpu.vector_store %arg14[%c0_11, %c0_12], %18 {strides = array<i32>} : memref<16x128xf32, #tpu.memory_space<vmem>>, vector<16x128xf32>,
    %c0_13 = arith.constant 0 : index
    %c0_14 = arith.constant 0 : index
    %c0_15 = arith.constant 0 : index
    %20 = vector.load %arg8[%c0_13, %c0_14, %c0_15] : memref<2x2x32xf32, #tpu.memory_space<vmem>>, vector<1x2x32xf32>
    %21 = vector.shape_cast %20 : vector<1x2x32xf32> to vector<2x32xf32>
    %c0_16 = arith.constant 0 : index
    %c0_17 = arith.constant 0 : index
    %22 = vector.load %arg15[%c0_16, %c0_17] : memref<2x32xf32, #tpu.memory_space<vmem>>, vector<2x32xf32>
    tpu.vector_store %arg15[%c0_16, %c0_17], %21 {strides = array<i32>} : memref<2x32xf32, #tpu.memory_space<vmem>>, vector<2x32xf32>,
    %c0_18 = arith.constant 0 : index
    %c0_19 = arith.constant 0 : index
    %c0_20 = arith.constant 0 : index
    %23 = vector.load %arg9[%c0_18, %c0_19, %c0_20] : memref<2x2x32xf32, #tpu.memory_space<vmem>>, vector<1x2x32xf32>
    %24 = vector.shape_cast %23 : vector<1x2x32xf32> to vector<2x32xf32>
    %c0_21 = arith.constant 0 : index
    %c0_22 = arith.constant 0 : index
    %25 = vector.load %arg16[%c0_21, %c0_22] : memref<2x32xf32, #tpu.memory_space<vmem>>, vector<2x32xf32>
    tpu.vector_store %arg16[%c0_21, %c0_22], %24 {strides = array<i32>} : memref<2x32xf32, #tpu.memory_space<vmem>>, vector<2x32xf32>,
    %c0_23 = arith.constant 0 : index
    %c0_24 = arith.constant 0 : index
    %26 = vector.load %arg14[%c0_23, %c0_24] : memref<16x128xf32, #tpu.memory_space<vmem>>, vector<2x128xf32>
    %c0_25 = arith.constant 0 : index
    %c0_26 = arith.constant 0 : index
    %27 = vector.load %arg15[%c0_25, %c0_26] : memref<2x32xf32, #tpu.memory_space<vmem>>, vector<2x32xf32>
    %cst_27 = arith.constant dense<0.000000e+00> : vector<2x128xf32>
    %28 = tpu.matmul %27, %12, %cst_27 {dimension_numbers = #tpu.dot_dimension_numbers<[1], [0], [0], [1], [0, 0, 1, 1], [], []>} : vector<2x32xf32>, vector<32x128xf32>, vector<2x128xf32> -> vector<2x128xf32>
    %29 = arith.addf %26, %28 : vector<2x128xf32>
    %30 = arith.mulf %29, %8 : vector<2x128xf32>
    %31 = math.tanh %30 : vector<2x128xf32>
    %32 = arith.mulf %31, %8 : vector<2x128xf32>
    %33 = arith.addf %32, %11 : vector<2x128xf32>
    %34 = vector.extract_strided_slice %33 {offsets = [0, 0], sizes = [2, 32], strides = [1, 1]} : vector<2x128xf32> to vector<2x32xf32>
    %35 = vector.extract_strided_slice %33 {offsets = [0, 32], sizes = [2, 32], strides = [1, 1]} : vector<2x128xf32> to vector<2x32xf32>
    %36 = vector.extract_strided_slice %33 {offsets = [0, 64], sizes = [2, 32], strides = [1, 1]} : vector<2x128xf32> to vector<2x32xf32>
    %37 = vector.extract_strided_slice %33 {offsets = [0, 96], sizes = [2, 32], strides = [1, 1]} : vector<2x128xf32> to vector<2x32xf32>
    %c0_28 = arith.constant 0 : index
    %c0_29 = arith.constant 0 : index
    %38 = vector.load %arg16[%c0_28, %c0_29] : memref<2x32xf32, #tpu.memory_space<vmem>>, vector<2x32xf32>
    %39 = arith.mulf %35, %38 : vector<2x32xf32>
    %40 = arith.mulf %34, %36 : vector<2x32xf32>
    %41 = arith.addf %39, %40 : vector<2x32xf32>
    %42 = math.tanh %41 : vector<2x32xf32>
    %43 = arith.mulf %37, %42 : vector<2x32xf32>
    %c0_30 = arith.constant 0 : index
    %c0_31 = arith.constant 0 : index
    %44 = vector.load %arg16[%c0_30, %c0_31] : memref<2x32xf32, #tpu.memory_space<vmem>>, vector<2x32xf32>
    tpu.vector_store %arg16[%c0_30, %c0_31], %41 {strides = array<i32>} : memref<2x32xf32, #tpu.memory_space<vmem>>, vector<2x32xf32>,
    %c0_32 = arith.constant 0 : index
    %c0_33 = arith.constant 0 : index
    %45 = vector.load %arg15[%c0_32, %c0_33] : memref<2x32xf32, #tpu.memory_space<vmem>>, vector<2x32xf32>
    tpu.vector_store %arg15[%c0_32, %c0_33], %43 {strides = array<i32>} : memref<2x32xf32, #tpu.memory_space<vmem>>, vector<2x32xf32>,
    %c0_34 = arith.constant 0 : index
    %c0_35 = arith.constant 0 : index
    %46 = vector.load %arg13[%c0_34, %c0_35] : memref<16x32xf32, #tpu.memory_space<vmem>>, vector<2x32xf32>
    tpu.vector_store %arg13[%c0_34, %c0_35], %43 {strides = array<i32>} : memref<16x32xf32, #tpu.memory_space<vmem>>, vector<2x32xf32>,
    %c2 = arith.constant 2 : index
    %c0_36 = arith.constant 0 : index
    %47 = vector.load %arg14[%c2, %c0_36] : memref<16x128xf32, #tpu.memory_space<vmem>>, vector<2x128xf32>
    %c0_37 = arith.constant 0 : index
    %c0_38 = arith.constant 0 : index
    %48 = vector.load %arg15[%c0_37, %c0_38] : memref<2x32xf32, #tpu.memory_space<vmem>>, vector<2x32xf32>
    %cst_39 = arith.constant dense<0.000000e+00> : vector<2x128xf32>
    %49 = tpu.matmul %48, %12, %cst_39 {dimension_numbers = #tpu.dot_dimension_numbers<[1], [0], [0], [1], [0, 0, 1, 1], [], []>} : vector<2x32xf32>, vector<32x128xf32>, vector<2x128xf32> -> vector<2x128xf32>
    %50 = arith.addf %47, %49 : vector<2x128xf32>
    %51 = arith.mulf %50, %8 : vector<2x128xf32>
    %52 = math.tanh %51 : vector<2x128xf32>
    %53 = arith.mulf %52, %8 : vector<2x128xf32>
    %54 = arith.addf %53, %11 : vector<2x128xf32>
    %55 = vector.extract_strided_slice %54 {offsets = [0, 0], sizes = [2, 32], strides = [1, 1]} : vector<2x128xf32> to vector<2x32xf32>
    %56 = vector.extract_strided_slice %54 {offsets = [0, 32], sizes = [2, 32], strides = [1, 1]} : vector<2x128xf32> to vector<2x32xf32>
    %57 = vector.extract_strided_slice %54 {offsets = [0, 64], sizes = [2, 32], strides = [1, 1]} : vector<2x128xf32> to vector<2x32xf32>
    %58 = vector.extract_strided_slice %54 {offsets = [0, 96], sizes = [2, 32], strides = [1, 1]} : vector<2x128xf32> to vector<2x32xf32>
    %c0_40 = arith.constant 0 : index
    %c0_41 = arith.constant 0 : index
    %59 = vector.load %arg16[%c0_40, %c0_41] : memref<2x32xf32, #tpu.memory_space<vmem>>, vector<2x32xf32>
    %60 = arith.mulf %56, %59 : vector<2x32xf32>
    %61 = arith.mulf %55, %57 : vector<2x32xf32>
    %62 = arith.addf %60, %61 : vector<2x32xf32>
    %63 = math.tanh %62 : vector<2x32xf32>
    %64 = arith.mulf %58, %63 : vector<2x32xf32>
    %c0_42 = arith.constant 0 : index
    %c0_43 = arith.constant 0 : index
    %65 = vector.load %arg16[%c0_42, %c0_43] : memref<2x32xf32, #tpu.memory_space<vmem>>, vector<2x32xf32>
    tpu.vector_store %arg16[%c0_42, %c0_43], %62 {strides = array<i32>} : memref<2x32xf32, #tpu.memory_space<vmem>>, vector<2x32xf32>,
    %c0_44 = arith.constant 0 : index
    %c0_45 = arith.constant 0 : index
    %66 = vector.load %arg15[%c0_44, %c0_45] : memref<2x32xf32, #tpu.memory_space<vmem>>, vector<2x32xf32>
    tpu.vector_store %arg15[%c0_44, %c0_45], %64 {strides = array<i32>} : memref<2x32xf32, #tpu.memory_space<vmem>>, vector<2x32xf32>,
    %c2_46 = arith.constant 2 : index
    %c0_47 = arith.constant 0 : index
    %67 = vector.load %arg13[%c2_46, %c0_47] : memref<16x32xf32, #tpu.memory_space<vmem>>, vector<2x32xf32>
    tpu.vector_store %arg13[%c2_46, %c0_47], %64 {strides = array<i32>} : memref<16x32xf32, #tpu.memory_space<vmem>>, vector<2x32xf32>,
    %c4 = arith.constant 4 : index
    %c0_48 = arith.constant 0 : index
    %68 = vector.load %arg14[%c4, %c0_48] : memref<16x128xf32, #tpu.memory_space<vmem>>, vector<2x128xf32>
    %c0_49 = arith.constant 0 : index
    %c0_50 = arith.constant 0 : index
    %69 = vector.load %arg15[%c0_49, %c0_50] : memref<2x32xf32, #tpu.memory_space<vmem>>, vector<2x32xf32>
    %cst_51 = arith.constant dense<0.000000e+00> : vector<2x128xf32>
    %70 = tpu.matmul %69, %12, %cst_51 {dimension_numbers = #tpu.dot_dimension_numbers<[1], [0], [0], [1], [0, 0, 1, 1], [], []>} : vector<2x32xf32>, vector<32x128xf32>, vector<2x128xf32> -> vector<2x128xf32>
    %71 = arith.addf %68, %70 : vector<2x128xf32>
    %72 = arith.mulf %71, %8 : vector<2x128xf32>
    %73 = math.tanh %72 : vector<2x128xf32>
    %74 = arith.mulf %73, %8 : vector<2x128xf32>
    %75 = arith.addf %74, %11 : vector<2x128xf32>
    %76 = vector.extract_strided_slice %75 {offsets = [0, 0], sizes = [2, 32], strides = [1, 1]} : vector<2x128xf32> to vector<2x32xf32>
    %77 = vector.extract_strided_slice %75 {offsets = [0, 32], sizes = [2, 32], strides = [1, 1]} : vector<2x128xf32> to vector<2x32xf32>
    %78 = vector.extract_strided_slice %75 {offsets = [0, 64], sizes = [2, 32], strides = [1, 1]} : vector<2x128xf32> to vector<2x32xf32>
    %79 = vector.extract_strided_slice %75 {offsets = [0, 96], sizes = [2, 32], strides = [1, 1]} : vector<2x128xf32> to vector<2x32xf32>
    %c0_52 = arith.constant 0 : index
    %c0_53 = arith.constant 0 : index
    %80 = vector.load %arg16[%c0_52, %c0_53] : memref<2x32xf32, #tpu.memory_space<vmem>>, vector<2x32xf32>
    %81 = arith.mulf %77, %80 : vector<2x32xf32>
    %82 = arith.mulf %76, %78 : vector<2x32xf32>
    %83 = arith.addf %81, %82 : vector<2x32xf32>
    %84 = math.tanh %83 : vector<2x32xf32>
    %85 = arith.mulf %79, %84 : vector<2x32xf32>
    %c0_54 = arith.constant 0 : index
    %c0_55 = arith.constant 0 : index
    %86 = vector.load %arg16[%c0_54, %c0_55] : memref<2x32xf32, #tpu.memory_space<vmem>>, vector<2x32xf32>
    tpu.vector_store %arg16[%c0_54, %c0_55], %83 {strides = array<i32>} : memref<2x32xf32, #tpu.memory_space<vmem>>, vector<2x32xf32>,
    %c0_56 = arith.constant 0 : index
    %c0_57 = arith.constant 0 : index
    %87 = vector.load %arg15[%c0_56, %c0_57] : memref<2x32xf32, #tpu.memory_space<vmem>>, vector<2x32xf32>
    tpu.vector_store %arg15[%c0_56, %c0_57], %85 {strides = array<i32>} : memref<2x32xf32, #tpu.memory_space<vmem>>, vector<2x32xf32>,
    %c4_58 = arith.constant 4 : index
    %c0_59 = arith.constant 0 : index
    %88 = vector.load %arg13[%c4_58, %c0_59] : memref<16x32xf32, #tpu.memory_space<vmem>>, vector<2x32xf32>
    tpu.vector_store %arg13[%c4_58, %c0_59], %85 {strides = array<i32>} : memref<16x32xf32, #tpu.memory_space<vmem>>, vector<2x32xf32>,
    %c6 = arith.constant 6 : index
    %c0_60 = arith.constant 0 : index
    %89 = vector.load %arg14[%c6, %c0_60] : memref<16x128xf32, #tpu.memory_space<vmem>>, vector<2x128xf32>
    %c0_61 = arith.constant 0 : index
    %c0_62 = arith.constant 0 : index
    %90 = vector.load %arg15[%c0_61, %c0_62] : memref<2x32xf32, #tpu.memory_space<vmem>>, vector<2x32xf32>
    %cst_63 = arith.constant dense<0.000000e+00> : vector<2x128xf32>
    %91 = tpu.matmul %90, %12, %cst_63 {dimension_numbers = #tpu.dot_dimension_numbers<[1], [0], [0], [1], [0, 0, 1, 1], [], []>} : vector<2x32xf32>, vector<32x128xf32>, vector<2x128xf32> -> vector<2x128xf32>
    %92 = arith.addf %89, %91 : vector<2x128xf32>
    %93 = arith.mulf %92, %8 : vector<2x128xf32>
    %94 = math.tanh %93 : vector<2x128xf32>
    %95 = arith.mulf %94, %8 : vector<2x128xf32>
    %96 = arith.addf %95, %11 : vector<2x128xf32>
    %97 = vector.extract_strided_slice %96 {offsets = [0, 0], sizes = [2, 32], strides = [1, 1]} : vector<2x128xf32> to vector<2x32xf32>
    %98 = vector.extract_strided_slice %96 {offsets = [0, 32], sizes = [2, 32], strides = [1, 1]} : vector<2x128xf32> to vector<2x32xf32>
    %99 = vector.extract_strided_slice %96 {offsets = [0, 64], sizes = [2, 32], strides = [1, 1]} : vector<2x128xf32> to vector<2x32xf32>
    %100 = vector.extract_strided_slice %96 {offsets = [0, 96], sizes = [2, 32], strides = [1, 1]} : vector<2x128xf32> to vector<2x32xf32>
    %c0_64 = arith.constant 0 : index
    %c0_65 = arith.constant 0 : index
    %101 = vector.load %arg16[%c0_64, %c0_65] : memref<2x32xf32, #tpu.memory_space<vmem>>, vector<2x32xf32>
    %102 = arith.mulf %98, %101 : vector<2x32xf32>
    %103 = arith.mulf %97, %99 : vector<2x32xf32>
    %104 = arith.addf %102, %103 : vector<2x32xf32>
    %105 = math.tanh %104 : vector<2x32xf32>
    %106 = arith.mulf %100, %105 : vector<2x32xf32>
    %c0_66 = arith.constant 0 : index
    %c0_67 = arith.constant 0 : index
    %107 = vector.load %arg16[%c0_66, %c0_67] : memref<2x32xf32, #tpu.memory_space<vmem>>, vector<2x32xf32>
    tpu.vector_store %arg16[%c0_66, %c0_67], %104 {strides = array<i32>} : memref<2x32xf32, #tpu.memory_space<vmem>>, vector<2x32xf32>,
    %c0_68 = arith.constant 0 : index
    %c0_69 = arith.constant 0 : index
    %108 = vector.load %arg15[%c0_68, %c0_69] : memref<2x32xf32, #tpu.memory_space<vmem>>, vector<2x32xf32>
    tpu.vector_store %arg15[%c0_68, %c0_69], %106 {strides = array<i32>} : memref<2x32xf32, #tpu.memory_space<vmem>>, vector<2x32xf32>,
    %c6_70 = arith.constant 6 : index
    %c0_71 = arith.constant 0 : index
    %109 = vector.load %arg13[%c6_70, %c0_71] : memref<16x32xf32, #tpu.memory_space<vmem>>, vector<2x32xf32>
    tpu.vector_store %arg13[%c6_70, %c0_71], %106 {strides = array<i32>} : memref<16x32xf32, #tpu.memory_space<vmem>>, vector<2x32xf32>,
    %c8 = arith.constant 8 : index
    %c0_72 = arith.constant 0 : index
    %110 = vector.load %arg14[%c8, %c0_72] : memref<16x128xf32, #tpu.memory_space<vmem>>, vector<2x128xf32>
    %c0_73 = arith.constant 0 : index
    %c0_74 = arith.constant 0 : index
    %111 = vector.load %arg15[%c0_73, %c0_74] : memref<2x32xf32, #tpu.memory_space<vmem>>, vector<2x32xf32>
    %cst_75 = arith.constant dense<0.000000e+00> : vector<2x128xf32>
    %112 = tpu.matmul %111, %12, %cst_75 {dimension_numbers = #tpu.dot_dimension_numbers<[1], [0], [0], [1], [0, 0, 1, 1], [], []>} : vector<2x32xf32>, vector<32x128xf32>, vector<2x128xf32> -> vector<2x128xf32>
    %113 = arith.addf %110, %112 : vector<2x128xf32>
    %114 = arith.mulf %113, %8 : vector<2x128xf32>
    %115 = math.tanh %114 : vector<2x128xf32>
    %116 = arith.mulf %115, %8 : vector<2x128xf32>
    %117 = arith.addf %116, %11 : vector<2x128xf32>
    %118 = vector.extract_strided_slice %117 {offsets = [0, 0], sizes = [2, 32], strides = [1, 1]} : vector<2x128xf32> to vector<2x32xf32>
    %119 = vector.extract_strided_slice %117 {offsets = [0, 32], sizes = [2, 32], strides = [1, 1]} : vector<2x128xf32> to vector<2x32xf32>
    %120 = vector.extract_strided_slice %117 {offsets = [0, 64], sizes = [2, 32], strides = [1, 1]} : vector<2x128xf32> to vector<2x32xf32>
    %121 = vector.extract_strided_slice %117 {offsets = [0, 96], sizes = [2, 32], strides = [1, 1]} : vector<2x128xf32> to vector<2x32xf32>
    %c0_76 = arith.constant 0 : index
    %c0_77 = arith.constant 0 : index
    %122 = vector.load %arg16[%c0_76, %c0_77] : memref<2x32xf32, #tpu.memory_space<vmem>>, vector<2x32xf32>
    %123 = arith.mulf %119, %122 : vector<2x32xf32>
    %124 = arith.mulf %118, %120 : vector<2x32xf32>
    %125 = arith.addf %123, %124 : vector<2x32xf32>
    %126 = math.tanh %125 : vector<2x32xf32>
    %127 = arith.mulf %121, %126 : vector<2x32xf32>
    %c0_78 = arith.constant 0 : index
    %c0_79 = arith.constant 0 : index
    %128 = vector.load %arg16[%c0_78, %c0_79] : memref<2x32xf32, #tpu.memory_space<vmem>>, vector<2x32xf32>
    tpu.vector_store %arg16[%c0_78, %c0_79], %125 {strides = array<i32>} : memref<2x32xf32, #tpu.memory_space<vmem>>, vector<2x32xf32>,
    %c0_80 = arith.constant 0 : index
    %c0_81 = arith.constant 0 : index
    %129 = vector.load %arg15[%c0_80, %c0_81] : memref<2x32xf32, #tpu.memory_space<vmem>>, vector<2x32xf32>
    tpu.vector_store %arg15[%c0_80, %c0_81], %127 {strides = array<i32>} : memref<2x32xf32, #tpu.memory_space<vmem>>, vector<2x32xf32>,
    %c8_82 = arith.constant 8 : index
    %c0_83 = arith.constant 0 : index
    %130 = vector.load %arg13[%c8_82, %c0_83] : memref<16x32xf32, #tpu.memory_space<vmem>>, vector<2x32xf32>
    tpu.vector_store %arg13[%c8_82, %c0_83], %127 {strides = array<i32>} : memref<16x32xf32, #tpu.memory_space<vmem>>, vector<2x32xf32>,
    %c10 = arith.constant 10 : index
    %c0_84 = arith.constant 0 : index
    %131 = vector.load %arg14[%c10, %c0_84] : memref<16x128xf32, #tpu.memory_space<vmem>>, vector<2x128xf32>
    %c0_85 = arith.constant 0 : index
    %c0_86 = arith.constant 0 : index
    %132 = vector.load %arg15[%c0_85, %c0_86] : memref<2x32xf32, #tpu.memory_space<vmem>>, vector<2x32xf32>
    %cst_87 = arith.constant dense<0.000000e+00> : vector<2x128xf32>
    %133 = tpu.matmul %132, %12, %cst_87 {dimension_numbers = #tpu.dot_dimension_numbers<[1], [0], [0], [1], [0, 0, 1, 1], [], []>} : vector<2x32xf32>, vector<32x128xf32>, vector<2x128xf32> -> vector<2x128xf32>
    %134 = arith.addf %131, %133 : vector<2x128xf32>
    %135 = arith.mulf %134, %8 : vector<2x128xf32>
    %136 = math.tanh %135 : vector<2x128xf32>
    %137 = arith.mulf %136, %8 : vector<2x128xf32>
    %138 = arith.addf %137, %11 : vector<2x128xf32>
    %139 = vector.extract_strided_slice %138 {offsets = [0, 0], sizes = [2, 32], strides = [1, 1]} : vector<2x128xf32> to vector<2x32xf32>
    %140 = vector.extract_strided_slice %138 {offsets = [0, 32], sizes = [2, 32], strides = [1, 1]} : vector<2x128xf32> to vector<2x32xf32>
    %141 = vector.extract_strided_slice %138 {offsets = [0, 64], sizes = [2, 32], strides = [1, 1]} : vector<2x128xf32> to vector<2x32xf32>
    %142 = vector.extract_strided_slice %138 {offsets = [0, 96], sizes = [2, 32], strides = [1, 1]} : vector<2x128xf32> to vector<2x32xf32>
    %c0_88 = arith.constant 0 : index
    %c0_89 = arith.constant 0 : index
    %143 = vector.load %arg16[%c0_88, %c0_89] : memref<2x32xf32, #tpu.memory_space<vmem>>, vector<2x32xf32>
    %144 = arith.mulf %140, %143 : vector<2x32xf32>
    %145 = arith.mulf %139, %141 : vector<2x32xf32>
    %146 = arith.addf %144, %145 : vector<2x32xf32>
    %147 = math.tanh %146 : vector<2x32xf32>
    %148 = arith.mulf %142, %147 : vector<2x32xf32>
    %c0_90 = arith.constant 0 : index
    %c0_91 = arith.constant 0 : index
    %149 = vector.load %arg16[%c0_90, %c0_91] : memref<2x32xf32, #tpu.memory_space<vmem>>, vector<2x32xf32>
    tpu.vector_store %arg16[%c0_90, %c0_91], %146 {strides = array<i32>} : memref<2x32xf32, #tpu.memory_space<vmem>>, vector<2x32xf32>,
    %c0_92 = arith.constant 0 : index
    %c0_93 = arith.constant 0 : index
    %150 = vector.load %arg15[%c0_92, %c0_93] : memref<2x32xf32, #tpu.memory_space<vmem>>, vector<2x32xf32>
    tpu.vector_store %arg15[%c0_92, %c0_93], %148 {strides = array<i32>} : memref<2x32xf32, #tpu.memory_space<vmem>>, vector<2x32xf32>,
    %c10_94 = arith.constant 10 : index
    %c0_95 = arith.constant 0 : index
    %151 = vector.load %arg13[%c10_94, %c0_95] : memref<16x32xf32, #tpu.memory_space<vmem>>, vector<2x32xf32>
    tpu.vector_store %arg13[%c10_94, %c0_95], %148 {strides = array<i32>} : memref<16x32xf32, #tpu.memory_space<vmem>>, vector<2x32xf32>,
    %c12 = arith.constant 12 : index
    %c0_96 = arith.constant 0 : index
    %152 = vector.load %arg14[%c12, %c0_96] : memref<16x128xf32, #tpu.memory_space<vmem>>, vector<2x128xf32>
    %c0_97 = arith.constant 0 : index
    %c0_98 = arith.constant 0 : index
    %153 = vector.load %arg15[%c0_97, %c0_98] : memref<2x32xf32, #tpu.memory_space<vmem>>, vector<2x32xf32>
    %cst_99 = arith.constant dense<0.000000e+00> : vector<2x128xf32>
    %154 = tpu.matmul %153, %12, %cst_99 {dimension_numbers = #tpu.dot_dimension_numbers<[1], [0], [0], [1], [0, 0, 1, 1], [], []>} : vector<2x32xf32>, vector<32x128xf32>, vector<2x128xf32> -> vector<2x128xf32>
    %155 = arith.addf %152, %154 : vector<2x128xf32>
    %156 = arith.mulf %155, %8 : vector<2x128xf32>
    %157 = math.tanh %156 : vector<2x128xf32>
    %158 = arith.mulf %157, %8 : vector<2x128xf32>
    %159 = arith.addf %158, %11 : vector<2x128xf32>
    %160 = vector.extract_strided_slice %159 {offsets = [0, 0], sizes = [2, 32], strides = [1, 1]} : vector<2x128xf32> to vector<2x32xf32>
    %161 = vector.extract_strided_slice %159 {offsets = [0, 32], sizes = [2, 32], strides = [1, 1]} : vector<2x128xf32> to vector<2x32xf32>
    %162 = vector.extract_strided_slice %159 {offsets = [0, 64], sizes = [2, 32], strides = [1, 1]} : vector<2x128xf32> to vector<2x32xf32>
    %163 = vector.extract_strided_slice %159 {offsets = [0, 96], sizes = [2, 32], strides = [1, 1]} : vector<2x128xf32> to vector<2x32xf32>
    %c0_100 = arith.constant 0 : index
    %c0_101 = arith.constant 0 : index
    %164 = vector.load %arg16[%c0_100, %c0_101] : memref<2x32xf32, #tpu.memory_space<vmem>>, vector<2x32xf32>
    %165 = arith.mulf %161, %164 : vector<2x32xf32>
    %166 = arith.mulf %160, %162 : vector<2x32xf32>
    %167 = arith.addf %165, %166 : vector<2x32xf32>
    %168 = math.tanh %167 : vector<2x32xf32>
    %169 = arith.mulf %163, %168 : vector<2x32xf32>
    %c0_102 = arith.constant 0 : index
    %c0_103 = arith.constant 0 : index
    %170 = vector.load %arg16[%c0_102, %c0_103] : memref<2x32xf32, #tpu.memory_space<vmem>>, vector<2x32xf32>
    tpu.vector_store %arg16[%c0_102, %c0_103], %167 {strides = array<i32>} : memref<2x32xf32, #tpu.memory_space<vmem>>, vector<2x32xf32>,
    %c0_104 = arith.constant 0 : index
    %c0_105 = arith.constant 0 : index
    %171 = vector.load %arg15[%c0_104, %c0_105] : memref<2x32xf32, #tpu.memory_space<vmem>>, vector<2x32xf32>
    tpu.vector_store %arg15[%c0_104, %c0_105], %169 {strides = array<i32>} : memref<2x32xf32, #tpu.memory_space<vmem>>, vector<2x32xf32>,
    %c12_106 = arith.constant 12 : index
    %c0_107 = arith.constant 0 : index
    %172 = vector.load %arg13[%c12_106, %c0_107] : memref<16x32xf32, #tpu.memory_space<vmem>>, vector<2x32xf32>
    tpu.vector_store %arg13[%c12_106, %c0_107], %169 {strides = array<i32>} : memref<16x32xf32, #tpu.memory_space<vmem>>, vector<2x32xf32>,
    %c14 = arith.constant 14 : index
    %c0_108 = arith.constant 0 : index
    %173 = vector.load %arg14[%c14, %c0_108] : memref<16x128xf32, #tpu.memory_space<vmem>>, vector<2x128xf32>
    %c0_109 = arith.constant 0 : index
    %c0_110 = arith.constant 0 : index
    %174 = vector.load %arg15[%c0_109, %c0_110] : memref<2x32xf32, #tpu.memory_space<vmem>>, vector<2x32xf32>
    %cst_111 = arith.constant dense<0.000000e+00> : vector<2x128xf32>
    %175 = tpu.matmul %174, %12, %cst_111 {dimension_numbers = #tpu.dot_dimension_numbers<[1], [0], [0], [1], [0, 0, 1, 1], [], []>} : vector<2x32xf32>, vector<32x128xf32>, vector<2x128xf32> -> vector<2x128xf32>
    %176 = arith.addf %173, %175 : vector<2x128xf32>
    %177 = arith.mulf %176, %8 : vector<2x128xf32>
    %178 = math.tanh %177 : vector<2x128xf32>
    %179 = arith.mulf %178, %8 : vector<2x128xf32>
    %180 = arith.addf %179, %11 : vector<2x128xf32>
    %181 = vector.extract_strided_slice %180 {offsets = [0, 0], sizes = [2, 32], strides = [1, 1]} : vector<2x128xf32> to vector<2x32xf32>
    %182 = vector.extract_strided_slice %180 {offsets = [0, 32], sizes = [2, 32], strides = [1, 1]} : vector<2x128xf32> to vector<2x32xf32>
    %183 = vector.extract_strided_slice %180 {offsets = [0, 64], sizes = [2, 32], strides = [1, 1]} : vector<2x128xf32> to vector<2x32xf32>
    %184 = vector.extract_strided_slice %180 {offsets = [0, 96], sizes = [2, 32], strides = [1, 1]} : vector<2x128xf32> to vector<2x32xf32>
    %c0_112 = arith.constant 0 : index
    %c0_113 = arith.constant 0 : index
    %185 = vector.load %arg16[%c0_112, %c0_113] : memref<2x32xf32, #tpu.memory_space<vmem>>, vector<2x32xf32>
    %186 = arith.mulf %182, %185 : vector<2x32xf32>
    %187 = arith.mulf %181, %183 : vector<2x32xf32>
    %188 = arith.addf %186, %187 : vector<2x32xf32>
    %189 = math.tanh %188 : vector<2x32xf32>
    %190 = arith.mulf %184, %189 : vector<2x32xf32>
    %c0_114 = arith.constant 0 : index
    %c0_115 = arith.constant 0 : index
    %191 = vector.load %arg16[%c0_114, %c0_115] : memref<2x32xf32, #tpu.memory_space<vmem>>, vector<2x32xf32>
    tpu.vector_store %arg16[%c0_114, %c0_115], %188 {strides = array<i32>} : memref<2x32xf32, #tpu.memory_space<vmem>>, vector<2x32xf32>,
    %c0_116 = arith.constant 0 : index
    %c0_117 = arith.constant 0 : index
    %192 = vector.load %arg15[%c0_116, %c0_117] : memref<2x32xf32, #tpu.memory_space<vmem>>, vector<2x32xf32>
    tpu.vector_store %arg15[%c0_116, %c0_117], %190 {strides = array<i32>} : memref<2x32xf32, #tpu.memory_space<vmem>>, vector<2x32xf32>,
    %c14_118 = arith.constant 14 : index
    %c0_119 = arith.constant 0 : index
    %193 = vector.load %arg13[%c14_118, %c0_119] : memref<16x32xf32, #tpu.memory_space<vmem>>, vector<2x32xf32>
    tpu.vector_store %arg13[%c14_118, %c0_119], %190 {strides = array<i32>} : memref<16x32xf32, #tpu.memory_space<vmem>>, vector<2x32xf32>,
    %c0_120 = arith.constant 0 : index
    %c0_121 = arith.constant 0 : index
    %194 = vector.load %arg6[%c0_120, %c0_121] : memref<32x128xf32, #tpu.memory_space<vmem>>, vector<32x128xf32>
    %c0_122 = arith.constant 0 : index
    %c0_123 = arith.constant 0 : index
    %195 = vector.load %arg13[%c0_122, %c0_123] : memref<16x32xf32, #tpu.memory_space<vmem>>, vector<16x32xf32>
    %c0_124 = arith.constant 0 : index
    %c0_125 = arith.constant 0 : index
    %196 = vector.load %arg5[%c0_124, %c0_125] : memref<32x128xf32, #tpu.memory_space<vmem>>, vector<32x128xf32>
    %cst_126 = arith.constant dense<0.000000e+00> : vector<16x128xf32>
    %197 = tpu.matmul %195, %196, %cst_126 {dimension_numbers = #tpu.dot_dimension_numbers<[1], [0], [0], [1], [0, 0, 1, 1], [], []>} : vector<16x32xf32>, vector<32x128xf32>, vector<16x128xf32> -> vector<16x128xf32>
    %c0_127 = arith.constant 0 : index
    %c0_128 = arith.constant 0 : index
    %198 = vector.load %arg7[%c0_127, %c0_128] : memref<1x128xf32, #tpu.memory_space<vmem>>, vector<1x128xf32>
    %199 = vector.broadcast %198 : vector<1x128xf32> to vector<16x128xf32>
    %200 = arith.addf %197, %199 : vector<16x128xf32>
    %c0_129 = arith.constant 0 : index
    %c0_130 = arith.constant 0 : index
    %201 = vector.load %arg14[%c0_129, %c0_130] : memref<16x128xf32, #tpu.memory_space<vmem>>, vector<16x128xf32>
    tpu.vector_store %arg14[%c0_129, %c0_130], %200 {strides = array<i32>} : memref<16x128xf32, #tpu.memory_space<vmem>>, vector<16x128xf32>,
    %c1 = arith.constant 1 : index
    %c0_131 = arith.constant 0 : index
    %c0_132 = arith.constant 0 : index
    %202 = vector.load %arg8[%c1, %c0_131, %c0_132] : memref<2x2x32xf32, #tpu.memory_space<vmem>>, vector<1x2x32xf32>
    %203 = vector.shape_cast %202 : vector<1x2x32xf32> to vector<2x32xf32>
    %c0_133 = arith.constant 0 : index
    %c0_134 = arith.constant 0 : index
    %204 = vector.load %arg15[%c0_133, %c0_134] : memref<2x32xf32, #tpu.memory_space<vmem>>, vector<2x32xf32>
    tpu.vector_store %arg15[%c0_133, %c0_134], %203 {strides = array<i32>} : memref<2x32xf32, #tpu.memory_space<vmem>>, vector<2x32xf32>,
    %c1_135 = arith.constant 1 : index
    %c0_136 = arith.constant 0 : index
    %c0_137 = arith.constant 0 : index
    %205 = vector.load %arg9[%c1_135, %c0_136, %c0_137] : memref<2x2x32xf32, #tpu.memory_space<vmem>>, vector<1x2x32xf32>
    %206 = vector.shape_cast %205 : vector<1x2x32xf32> to vector<2x32xf32>
    %c0_138 = arith.constant 0 : index
    %c0_139 = arith.constant 0 : index
    %207 = vector.load %arg16[%c0_138, %c0_139] : memref<2x32xf32, #tpu.memory_space<vmem>>, vector<2x32xf32>
    tpu.vector_store %arg16[%c0_138, %c0_139], %206 {strides = array<i32>} : memref<2x32xf32, #tpu.memory_space<vmem>>, vector<2x32xf32>,
    %c0_140 = arith.constant 0 : index
    %c0_141 = arith.constant 0 : index
    %208 = vector.load %arg14[%c0_140, %c0_141] : memref<16x128xf32, #tpu.memory_space<vmem>>, vector<2x128xf32>
    %c0_142 = arith.constant 0 : index
    %c0_143 = arith.constant 0 : index
    %209 = vector.load %arg15[%c0_142, %c0_143] : memref<2x32xf32, #tpu.memory_space<vmem>>, vector<2x32xf32>
    %cst_144 = arith.constant dense<0.000000e+00> : vector<2x128xf32>
    %210 = tpu.matmul %209, %194, %cst_144 {dimension_numbers = #tpu.dot_dimension_numbers<[1], [0], [0], [1], [0, 0, 1, 1], [], []>} : vector<2x32xf32>, vector<32x128xf32>, vector<2x128xf32> -> vector<2x128xf32>
    %211 = arith.addf %208, %210 : vector<2x128xf32>
    %212 = arith.mulf %211, %8 : vector<2x128xf32>
    %213 = math.tanh %212 : vector<2x128xf32>
    %214 = arith.mulf %213, %8 : vector<2x128xf32>
    %215 = arith.addf %214, %11 : vector<2x128xf32>
    %216 = vector.extract_strided_slice %215 {offsets = [0, 0], sizes = [2, 32], strides = [1, 1]} : vector<2x128xf32> to vector<2x32xf32>
    %217 = vector.extract_strided_slice %215 {offsets = [0, 32], sizes = [2, 32], strides = [1, 1]} : vector<2x128xf32> to vector<2x32xf32>
    %218 = vector.extract_strided_slice %215 {offsets = [0, 64], sizes = [2, 32], strides = [1, 1]} : vector<2x128xf32> to vector<2x32xf32>
    %219 = vector.extract_strided_slice %215 {offsets = [0, 96], sizes = [2, 32], strides = [1, 1]} : vector<2x128xf32> to vector<2x32xf32>
    %c0_145 = arith.constant 0 : index
    %c0_146 = arith.constant 0 : index
    %220 = vector.load %arg16[%c0_145, %c0_146] : memref<2x32xf32, #tpu.memory_space<vmem>>, vector<2x32xf32>
    %221 = arith.mulf %217, %220 : vector<2x32xf32>
    %222 = arith.mulf %216, %218 : vector<2x32xf32>
    %223 = arith.addf %221, %222 : vector<2x32xf32>
    %224 = math.tanh %223 : vector<2x32xf32>
    %225 = arith.mulf %219, %224 : vector<2x32xf32>
    %c0_147 = arith.constant 0 : index
    %c0_148 = arith.constant 0 : index
    %226 = vector.load %arg16[%c0_147, %c0_148] : memref<2x32xf32, #tpu.memory_space<vmem>>, vector<2x32xf32>
    tpu.vector_store %arg16[%c0_147, %c0_148], %223 {strides = array<i32>} : memref<2x32xf32, #tpu.memory_space<vmem>>, vector<2x32xf32>,
    %c0_149 = arith.constant 0 : index
    %c0_150 = arith.constant 0 : index
    %227 = vector.load %arg15[%c0_149, %c0_150] : memref<2x32xf32, #tpu.memory_space<vmem>>, vector<2x32xf32>
    tpu.vector_store %arg15[%c0_149, %c0_150], %225 {strides = array<i32>} : memref<2x32xf32, #tpu.memory_space<vmem>>, vector<2x32xf32>,
    %c2_151 = arith.constant 2 : index
    %c0_152 = arith.constant 0 : index
    %228 = vector.load %arg14[%c2_151, %c0_152] : memref<16x128xf32, #tpu.memory_space<vmem>>, vector<2x128xf32>
    %c0_153 = arith.constant 0 : index
    %c0_154 = arith.constant 0 : index
    %229 = vector.load %arg15[%c0_153, %c0_154] : memref<2x32xf32, #tpu.memory_space<vmem>>, vector<2x32xf32>
    %cst_155 = arith.constant dense<0.000000e+00> : vector<2x128xf32>
    %230 = tpu.matmul %229, %194, %cst_155 {dimension_numbers = #tpu.dot_dimension_numbers<[1], [0], [0], [1], [0, 0, 1, 1], [], []>} : vector<2x32xf32>, vector<32x128xf32>, vector<2x128xf32> -> vector<2x128xf32>
    %231 = arith.addf %228, %230 : vector<2x128xf32>
    %232 = arith.mulf %231, %8 : vector<2x128xf32>
    %233 = math.tanh %232 : vector<2x128xf32>
    %234 = arith.mulf %233, %8 : vector<2x128xf32>
    %235 = arith.addf %234, %11 : vector<2x128xf32>
    %236 = vector.extract_strided_slice %235 {offsets = [0, 0], sizes = [2, 32], strides = [1, 1]} : vector<2x128xf32> to vector<2x32xf32>
    %237 = vector.extract_strided_slice %235 {offsets = [0, 32], sizes = [2, 32], strides = [1, 1]} : vector<2x128xf32> to vector<2x32xf32>
    %238 = vector.extract_strided_slice %235 {offsets = [0, 64], sizes = [2, 32], strides = [1, 1]} : vector<2x128xf32> to vector<2x32xf32>
    %239 = vector.extract_strided_slice %235 {offsets = [0, 96], sizes = [2, 32], strides = [1, 1]} : vector<2x128xf32> to vector<2x32xf32>
    %c0_156 = arith.constant 0 : index
    %c0_157 = arith.constant 0 : index
    %240 = vector.load %arg16[%c0_156, %c0_157] : memref<2x32xf32, #tpu.memory_space<vmem>>, vector<2x32xf32>
    %241 = arith.mulf %237, %240 : vector<2x32xf32>
    %242 = arith.mulf %236, %238 : vector<2x32xf32>
    %243 = arith.addf %241, %242 : vector<2x32xf32>
    %244 = math.tanh %243 : vector<2x32xf32>
    %245 = arith.mulf %239, %244 : vector<2x32xf32>
    %c0_158 = arith.constant 0 : index
    %c0_159 = arith.constant 0 : index
    %246 = vector.load %arg16[%c0_158, %c0_159] : memref<2x32xf32, #tpu.memory_space<vmem>>, vector<2x32xf32>
    tpu.vector_store %arg16[%c0_158, %c0_159], %243 {strides = array<i32>} : memref<2x32xf32, #tpu.memory_space<vmem>>, vector<2x32xf32>,
    %c0_160 = arith.constant 0 : index
    %c0_161 = arith.constant 0 : index
    %247 = vector.load %arg15[%c0_160, %c0_161] : memref<2x32xf32, #tpu.memory_space<vmem>>, vector<2x32xf32>
    tpu.vector_store %arg15[%c0_160, %c0_161], %245 {strides = array<i32>} : memref<2x32xf32, #tpu.memory_space<vmem>>, vector<2x32xf32>,
    %c4_162 = arith.constant 4 : index
    %c0_163 = arith.constant 0 : index
    %248 = vector.load %arg14[%c4_162, %c0_163] : memref<16x128xf32, #tpu.memory_space<vmem>>, vector<2x128xf32>
    %c0_164 = arith.constant 0 : index
    %c0_165 = arith.constant 0 : index
    %249 = vector.load %arg15[%c0_164, %c0_165] : memref<2x32xf32, #tpu.memory_space<vmem>>, vector<2x32xf32>
    %cst_166 = arith.constant dense<0.000000e+00> : vector<2x128xf32>
    %250 = tpu.matmul %249, %194, %cst_166 {dimension_numbers = #tpu.dot_dimension_numbers<[1], [0], [0], [1], [0, 0, 1, 1], [], []>} : vector<2x32xf32>, vector<32x128xf32>, vector<2x128xf32> -> vector<2x128xf32>
    %251 = arith.addf %248, %250 : vector<2x128xf32>
    %252 = arith.mulf %251, %8 : vector<2x128xf32>
    %253 = math.tanh %252 : vector<2x128xf32>
    %254 = arith.mulf %253, %8 : vector<2x128xf32>
    %255 = arith.addf %254, %11 : vector<2x128xf32>
    %256 = vector.extract_strided_slice %255 {offsets = [0, 0], sizes = [2, 32], strides = [1, 1]} : vector<2x128xf32> to vector<2x32xf32>
    %257 = vector.extract_strided_slice %255 {offsets = [0, 32], sizes = [2, 32], strides = [1, 1]} : vector<2x128xf32> to vector<2x32xf32>
    %258 = vector.extract_strided_slice %255 {offsets = [0, 64], sizes = [2, 32], strides = [1, 1]} : vector<2x128xf32> to vector<2x32xf32>
    %259 = vector.extract_strided_slice %255 {offsets = [0, 96], sizes = [2, 32], strides = [1, 1]} : vector<2x128xf32> to vector<2x32xf32>
    %c0_167 = arith.constant 0 : index
    %c0_168 = arith.constant 0 : index
    %260 = vector.load %arg16[%c0_167, %c0_168] : memref<2x32xf32, #tpu.memory_space<vmem>>, vector<2x32xf32>
    %261 = arith.mulf %257, %260 : vector<2x32xf32>
    %262 = arith.mulf %256, %258 : vector<2x32xf32>
    %263 = arith.addf %261, %262 : vector<2x32xf32>
    %264 = math.tanh %263 : vector<2x32xf32>
    %265 = arith.mulf %259, %264 : vector<2x32xf32>
    %c0_169 = arith.constant 0 : index
    %c0_170 = arith.constant 0 : index
    %266 = vector.load %arg16[%c0_169, %c0_170] : memref<2x32xf32, #tpu.memory_space<vmem>>, vector<2x32xf32>
    tpu.vector_store %arg16[%c0_169, %c0_170], %263 {strides = array<i32>} : memref<2x32xf32, #tpu.memory_space<vmem>>, vector<2x32xf32>,
    %c0_171 = arith.constant 0 : index
    %c0_172 = arith.constant 0 : index
    %267 = vector.load %arg15[%c0_171, %c0_172] : memref<2x32xf32, #tpu.memory_space<vmem>>, vector<2x32xf32>
    tpu.vector_store %arg15[%c0_171, %c0_172], %265 {strides = array<i32>} : memref<2x32xf32, #tpu.memory_space<vmem>>, vector<2x32xf32>,
    %c6_173 = arith.constant 6 : index
    %c0_174 = arith.constant 0 : index
    %268 = vector.load %arg14[%c6_173, %c0_174] : memref<16x128xf32, #tpu.memory_space<vmem>>, vector<2x128xf32>
    %c0_175 = arith.constant 0 : index
    %c0_176 = arith.constant 0 : index
    %269 = vector.load %arg15[%c0_175, %c0_176] : memref<2x32xf32, #tpu.memory_space<vmem>>, vector<2x32xf32>
    %cst_177 = arith.constant dense<0.000000e+00> : vector<2x128xf32>
    %270 = tpu.matmul %269, %194, %cst_177 {dimension_numbers = #tpu.dot_dimension_numbers<[1], [0], [0], [1], [0, 0, 1, 1], [], []>} : vector<2x32xf32>, vector<32x128xf32>, vector<2x128xf32> -> vector<2x128xf32>
    %271 = arith.addf %268, %270 : vector<2x128xf32>
    %272 = arith.mulf %271, %8 : vector<2x128xf32>
    %273 = math.tanh %272 : vector<2x128xf32>
    %274 = arith.mulf %273, %8 : vector<2x128xf32>
    %275 = arith.addf %274, %11 : vector<2x128xf32>
    %276 = vector.extract_strided_slice %275 {offsets = [0, 0], sizes = [2, 32], strides = [1, 1]} : vector<2x128xf32> to vector<2x32xf32>
    %277 = vector.extract_strided_slice %275 {offsets = [0, 32], sizes = [2, 32], strides = [1, 1]} : vector<2x128xf32> to vector<2x32xf32>
    %278 = vector.extract_strided_slice %275 {offsets = [0, 64], sizes = [2, 32], strides = [1, 1]} : vector<2x128xf32> to vector<2x32xf32>
    %279 = vector.extract_strided_slice %275 {offsets = [0, 96], sizes = [2, 32], strides = [1, 1]} : vector<2x128xf32> to vector<2x32xf32>
    %c0_178 = arith.constant 0 : index
    %c0_179 = arith.constant 0 : index
    %280 = vector.load %arg16[%c0_178, %c0_179] : memref<2x32xf32, #tpu.memory_space<vmem>>, vector<2x32xf32>
    %281 = arith.mulf %277, %280 : vector<2x32xf32>
    %282 = arith.mulf %276, %278 : vector<2x32xf32>
    %283 = arith.addf %281, %282 : vector<2x32xf32>
    %284 = math.tanh %283 : vector<2x32xf32>
    %285 = arith.mulf %279, %284 : vector<2x32xf32>
    %c0_180 = arith.constant 0 : index
    %c0_181 = arith.constant 0 : index
    %286 = vector.load %arg16[%c0_180, %c0_181] : memref<2x32xf32, #tpu.memory_space<vmem>>, vector<2x32xf32>
    tpu.vector_store %arg16[%c0_180, %c0_181], %283 {strides = array<i32>} : memref<2x32xf32, #tpu.memory_space<vmem>>, vector<2x32xf32>,
    %c0_182 = arith.constant 0 : index
    %c0_183 = arith.constant 0 : index
    %287 = vector.load %arg15[%c0_182, %c0_183] : memref<2x32xf32, #tpu.memory_space<vmem>>, vector<2x32xf32>
    tpu.vector_store %arg15[%c0_182, %c0_183], %285 {strides = array<i32>} : memref<2x32xf32, #tpu.memory_space<vmem>>, vector<2x32xf32>,
    %c8_184 = arith.constant 8 : index
    %c0_185 = arith.constant 0 : index
    %288 = vector.load %arg14[%c8_184, %c0_185] : memref<16x128xf32, #tpu.memory_space<vmem>>, vector<2x128xf32>
    %c0_186 = arith.constant 0 : index
    %c0_187 = arith.constant 0 : index
    %289 = vector.load %arg15[%c0_186, %c0_187] : memref<2x32xf32, #tpu.memory_space<vmem>>, vector<2x32xf32>
    %cst_188 = arith.constant dense<0.000000e+00> : vector<2x128xf32>
    %290 = tpu.matmul %289, %194, %cst_188 {dimension_numbers = #tpu.dot_dimension_numbers<[1], [0], [0], [1], [0, 0, 1, 1], [], []>} : vector<2x32xf32>, vector<32x128xf32>, vector<2x128xf32> -> vector<2x128xf32>
    %291 = arith.addf %288, %290 : vector<2x128xf32>
    %292 = arith.mulf %291, %8 : vector<2x128xf32>
    %293 = math.tanh %292 : vector<2x128xf32>
    %294 = arith.mulf %293, %8 : vector<2x128xf32>
    %295 = arith.addf %294, %11 : vector<2x128xf32>
    %296 = vector.extract_strided_slice %295 {offsets = [0, 0], sizes = [2, 32], strides = [1, 1]} : vector<2x128xf32> to vector<2x32xf32>
    %297 = vector.extract_strided_slice %295 {offsets = [0, 32], sizes = [2, 32], strides = [1, 1]} : vector<2x128xf32> to vector<2x32xf32>
    %298 = vector.extract_strided_slice %295 {offsets = [0, 64], sizes = [2, 32], strides = [1, 1]} : vector<2x128xf32> to vector<2x32xf32>
    %299 = vector.extract_strided_slice %295 {offsets = [0, 96], sizes = [2, 32], strides = [1, 1]} : vector<2x128xf32> to vector<2x32xf32>
    %c0_189 = arith.constant 0 : index
    %c0_190 = arith.constant 0 : index
    %300 = vector.load %arg16[%c0_189, %c0_190] : memref<2x32xf32, #tpu.memory_space<vmem>>, vector<2x32xf32>
    %301 = arith.mulf %297, %300 : vector<2x32xf32>
    %302 = arith.mulf %296, %298 : vector<2x32xf32>
    %303 = arith.addf %301, %302 : vector<2x32xf32>
    %304 = math.tanh %303 : vector<2x32xf32>
    %305 = arith.mulf %299, %304 : vector<2x32xf32>
    %c0_191 = arith.constant 0 : index
    %c0_192 = arith.constant 0 : index
    %306 = vector.load %arg16[%c0_191, %c0_192] : memref<2x32xf32, #tpu.memory_space<vmem>>, vector<2x32xf32>
    tpu.vector_store %arg16[%c0_191, %c0_192], %303 {strides = array<i32>} : memref<2x32xf32, #tpu.memory_space<vmem>>, vector<2x32xf32>,
    %c0_193 = arith.constant 0 : index
    %c0_194 = arith.constant 0 : index
    %307 = vector.load %arg15[%c0_193, %c0_194] : memref<2x32xf32, #tpu.memory_space<vmem>>, vector<2x32xf32>
    tpu.vector_store %arg15[%c0_193, %c0_194], %305 {strides = array<i32>} : memref<2x32xf32, #tpu.memory_space<vmem>>, vector<2x32xf32>,
    %c10_195 = arith.constant 10 : index
    %c0_196 = arith.constant 0 : index
    %308 = vector.load %arg14[%c10_195, %c0_196] : memref<16x128xf32, #tpu.memory_space<vmem>>, vector<2x128xf32>
    %c0_197 = arith.constant 0 : index
    %c0_198 = arith.constant 0 : index
    %309 = vector.load %arg15[%c0_197, %c0_198] : memref<2x32xf32, #tpu.memory_space<vmem>>, vector<2x32xf32>
    %cst_199 = arith.constant dense<0.000000e+00> : vector<2x128xf32>
    %310 = tpu.matmul %309, %194, %cst_199 {dimension_numbers = #tpu.dot_dimension_numbers<[1], [0], [0], [1], [0, 0, 1, 1], [], []>} : vector<2x32xf32>, vector<32x128xf32>, vector<2x128xf32> -> vector<2x128xf32>
    %311 = arith.addf %308, %310 : vector<2x128xf32>
    %312 = arith.mulf %311, %8 : vector<2x128xf32>
    %313 = math.tanh %312 : vector<2x128xf32>
    %314 = arith.mulf %313, %8 : vector<2x128xf32>
    %315 = arith.addf %314, %11 : vector<2x128xf32>
    %316 = vector.extract_strided_slice %315 {offsets = [0, 0], sizes = [2, 32], strides = [1, 1]} : vector<2x128xf32> to vector<2x32xf32>
    %317 = vector.extract_strided_slice %315 {offsets = [0, 32], sizes = [2, 32], strides = [1, 1]} : vector<2x128xf32> to vector<2x32xf32>
    %318 = vector.extract_strided_slice %315 {offsets = [0, 64], sizes = [2, 32], strides = [1, 1]} : vector<2x128xf32> to vector<2x32xf32>
    %319 = vector.extract_strided_slice %315 {offsets = [0, 96], sizes = [2, 32], strides = [1, 1]} : vector<2x128xf32> to vector<2x32xf32>
    %c0_200 = arith.constant 0 : index
    %c0_201 = arith.constant 0 : index
    %320 = vector.load %arg16[%c0_200, %c0_201] : memref<2x32xf32, #tpu.memory_space<vmem>>, vector<2x32xf32>
    %321 = arith.mulf %317, %320 : vector<2x32xf32>
    %322 = arith.mulf %316, %318 : vector<2x32xf32>
    %323 = arith.addf %321, %322 : vector<2x32xf32>
    %324 = math.tanh %323 : vector<2x32xf32>
    %325 = arith.mulf %319, %324 : vector<2x32xf32>
    %c0_202 = arith.constant 0 : index
    %c0_203 = arith.constant 0 : index
    %326 = vector.load %arg16[%c0_202, %c0_203] : memref<2x32xf32, #tpu.memory_space<vmem>>, vector<2x32xf32>
    tpu.vector_store %arg16[%c0_202, %c0_203], %323 {strides = array<i32>} : memref<2x32xf32, #tpu.memory_space<vmem>>, vector<2x32xf32>,
    %c0_204 = arith.constant 0 : index
    %c0_205 = arith.constant 0 : index
    %327 = vector.load %arg15[%c0_204, %c0_205] : memref<2x32xf32, #tpu.memory_space<vmem>>, vector<2x32xf32>
    tpu.vector_store %arg15[%c0_204, %c0_205], %325 {strides = array<i32>} : memref<2x32xf32, #tpu.memory_space<vmem>>, vector<2x32xf32>,
    %c12_206 = arith.constant 12 : index
    %c0_207 = arith.constant 0 : index
    %328 = vector.load %arg14[%c12_206, %c0_207] : memref<16x128xf32, #tpu.memory_space<vmem>>, vector<2x128xf32>
    %c0_208 = arith.constant 0 : index
    %c0_209 = arith.constant 0 : index
    %329 = vector.load %arg15[%c0_208, %c0_209] : memref<2x32xf32, #tpu.memory_space<vmem>>, vector<2x32xf32>
    %cst_210 = arith.constant dense<0.000000e+00> : vector<2x128xf32>
    %330 = tpu.matmul %329, %194, %cst_210 {dimension_numbers = #tpu.dot_dimension_numbers<[1], [0], [0], [1], [0, 0, 1, 1], [], []>} : vector<2x32xf32>, vector<32x128xf32>, vector<2x128xf32> -> vector<2x128xf32>
    %331 = arith.addf %328, %330 : vector<2x128xf32>
    %332 = arith.mulf %331, %8 : vector<2x128xf32>
    %333 = math.tanh %332 : vector<2x128xf32>
    %334 = arith.mulf %333, %8 : vector<2x128xf32>
    %335 = arith.addf %334, %11 : vector<2x128xf32>
    %336 = vector.extract_strided_slice %335 {offsets = [0, 0], sizes = [2, 32], strides = [1, 1]} : vector<2x128xf32> to vector<2x32xf32>
    %337 = vector.extract_strided_slice %335 {offsets = [0, 32], sizes = [2, 32], strides = [1, 1]} : vector<2x128xf32> to vector<2x32xf32>
    %338 = vector.extract_strided_slice %335 {offsets = [0, 64], sizes = [2, 32], strides = [1, 1]} : vector<2x128xf32> to vector<2x32xf32>
    %339 = vector.extract_strided_slice %335 {offsets = [0, 96], sizes = [2, 32], strides = [1, 1]} : vector<2x128xf32> to vector<2x32xf32>
    %c0_211 = arith.constant 0 : index
    %c0_212 = arith.constant 0 : index
    %340 = vector.load %arg16[%c0_211, %c0_212] : memref<2x32xf32, #tpu.memory_space<vmem>>, vector<2x32xf32>
    %341 = arith.mulf %337, %340 : vector<2x32xf32>
    %342 = arith.mulf %336, %338 : vector<2x32xf32>
    %343 = arith.addf %341, %342 : vector<2x32xf32>
    %344 = math.tanh %343 : vector<2x32xf32>
    %345 = arith.mulf %339, %344 : vector<2x32xf32>
    %c0_213 = arith.constant 0 : index
    %c0_214 = arith.constant 0 : index
    %346 = vector.load %arg16[%c0_213, %c0_214] : memref<2x32xf32, #tpu.memory_space<vmem>>, vector<2x32xf32>
    tpu.vector_store %arg16[%c0_213, %c0_214], %343 {strides = array<i32>} : memref<2x32xf32, #tpu.memory_space<vmem>>, vector<2x32xf32>,
    %c0_215 = arith.constant 0 : index
    %c0_216 = arith.constant 0 : index
    %347 = vector.load %arg15[%c0_215, %c0_216] : memref<2x32xf32, #tpu.memory_space<vmem>>, vector<2x32xf32>
    tpu.vector_store %arg15[%c0_215, %c0_216], %345 {strides = array<i32>} : memref<2x32xf32, #tpu.memory_space<vmem>>, vector<2x32xf32>,
    %c14_217 = arith.constant 14 : index
    %c0_218 = arith.constant 0 : index
    %348 = vector.load %arg14[%c14_217, %c0_218] : memref<16x128xf32, #tpu.memory_space<vmem>>, vector<2x128xf32>
    %c0_219 = arith.constant 0 : index
    %c0_220 = arith.constant 0 : index
    %349 = vector.load %arg15[%c0_219, %c0_220] : memref<2x32xf32, #tpu.memory_space<vmem>>, vector<2x32xf32>
    %cst_221 = arith.constant dense<0.000000e+00> : vector<2x128xf32>
    %350 = tpu.matmul %349, %194, %cst_221 {dimension_numbers = #tpu.dot_dimension_numbers<[1], [0], [0], [1], [0, 0, 1, 1], [], []>} : vector<2x32xf32>, vector<32x128xf32>, vector<2x128xf32> -> vector<2x128xf32>
    %351 = arith.addf %348, %350 : vector<2x128xf32>
    %352 = arith.mulf %351, %8 : vector<2x128xf32>
    %353 = math.tanh %352 : vector<2x128xf32>
    %354 = arith.mulf %353, %8 : vector<2x128xf32>
    %355 = arith.addf %354, %11 : vector<2x128xf32>
    %356 = vector.extract_strided_slice %355 {offsets = [0, 0], sizes = [2, 32], strides = [1, 1]} : vector<2x128xf32> to vector<2x32xf32>
    %357 = vector.extract_strided_slice %355 {offsets = [0, 32], sizes = [2, 32], strides = [1, 1]} : vector<2x128xf32> to vector<2x32xf32>
    %358 = vector.extract_strided_slice %355 {offsets = [0, 64], sizes = [2, 32], strides = [1, 1]} : vector<2x128xf32> to vector<2x32xf32>
    %359 = vector.extract_strided_slice %355 {offsets = [0, 96], sizes = [2, 32], strides = [1, 1]} : vector<2x128xf32> to vector<2x32xf32>
    %c0_222 = arith.constant 0 : index
    %c0_223 = arith.constant 0 : index
    %360 = vector.load %arg16[%c0_222, %c0_223] : memref<2x32xf32, #tpu.memory_space<vmem>>, vector<2x32xf32>
    %361 = arith.mulf %357, %360 : vector<2x32xf32>
    %362 = arith.mulf %356, %358 : vector<2x32xf32>
    %363 = arith.addf %361, %362 : vector<2x32xf32>
    %364 = math.tanh %363 : vector<2x32xf32>
    %365 = arith.mulf %359, %364 : vector<2x32xf32>
    %c0_224 = arith.constant 0 : index
    %c0_225 = arith.constant 0 : index
    %366 = vector.load %arg16[%c0_224, %c0_225] : memref<2x32xf32, #tpu.memory_space<vmem>>, vector<2x32xf32>
    tpu.vector_store %arg16[%c0_224, %c0_225], %363 {strides = array<i32>} : memref<2x32xf32, #tpu.memory_space<vmem>>, vector<2x32xf32>,
    %c0_226 = arith.constant 0 : index
    %c0_227 = arith.constant 0 : index
    %367 = vector.load %arg15[%c0_226, %c0_227] : memref<2x32xf32, #tpu.memory_space<vmem>>, vector<2x32xf32>
    tpu.vector_store %arg15[%c0_226, %c0_227], %365 {strides = array<i32>} : memref<2x32xf32, #tpu.memory_space<vmem>>, vector<2x32xf32>,
    %c0_228 = arith.constant 0 : index
    %c0_229 = arith.constant 0 : index
    %368 = vector.load %arg15[%c0_228, %c0_229] : memref<2x32xf32, #tpu.memory_space<vmem>>, vector<2x32xf32>
    %c0_230 = arith.constant 0 : index
    %c0_231 = arith.constant 0 : index
    %369 = vector.load %arg10[%c0_230, %c0_231] : memref<32x1xf32, #tpu.memory_space<vmem>>, vector<32x1xf32>
    %cst_232 = arith.constant dense<0.000000e+00> : vector<2x1xf32>
    %370 = tpu.matmul %368, %369, %cst_232 {dimension_numbers = #tpu.dot_dimension_numbers<[1], [0], [0], [1], [0, 0, 1, 1], [], []>} : vector<2x32xf32>, vector<32x1xf32>, vector<2x1xf32> -> vector<2x1xf32>
    %c0_233 = arith.constant 0 : index
    %c0_234 = arith.constant 0 : index
    %371 = vector.load %arg11[%c0_233, %c0_234] : memref<1x1xf32, #tpu.memory_space<vmem>>, vector<1x1xf32>
    %372 = vector.broadcast %371 : vector<1x1xf32> to vector<2x1xf32>
    %373 = arith.addf %370, %372 : vector<2x1xf32>
    %c0_235 = arith.constant 0 : index
    %c0_236 = arith.constant 0 : index
    %374 = vector.load %arg12[%c0_235, %c0_236] : memref<2x1xf32, #tpu.memory_space<vmem>>, vector<2x1xf32>
    tpu.vector_store %arg12[%c0_235, %c0_236], %373 {strides = array<i32>} : memref<2x1xf32, #tpu.memory_space<vmem>>, vector<2x1xf32>,
    return
  }
  func.func @transform_0(%arg0: i32) -> (i32, i32) {
    %c0_i32 = arith.constant 0 : i32
    %c0_i32_0 = arith.constant 0 : i32
    %c0_i32_1 = arith.constant 0 : i32
    return %c0_i32, %c0_i32_0 : i32, i32
  }
  func.func @transform_1(%arg0: i32) -> (i32, i32) {
    %c0_i32 = arith.constant 0 : i32
    %c0_i32_0 = arith.constant 0 : i32
    %c0_i32_1 = arith.constant 0 : i32
    return %c0_i32, %c0_i32_0 : i32, i32
  }
  func.func @transform_2(%arg0: i32) -> (i32, i32) {
    %c0_i32 = arith.constant 0 : i32
    %c0_i32_0 = arith.constant 0 : i32
    %c0_i32_1 = arith.constant 0 : i32
    return %c0_i32, %c0_i32_0 : i32, i32
  }
  func.func @transform_3(%arg0: i32) -> (i32, i32) {
    %c0_i32 = arith.constant 0 : i32
    %c0_i32_0 = arith.constant 0 : i32
    %c0_i32_1 = arith.constant 0 : i32
    return %c0_i32, %c0_i32_0 : i32, i32
  }
  func.func @transform_4(%arg0: i32) -> (i32, i32) {
    %c0_i32 = arith.constant 0 : i32
    %c0_i32_0 = arith.constant 0 : i32
    %c0_i32_1 = arith.constant 0 : i32
    return %c0_i32, %c0_i32_0 : i32, i32
  }
  func.func @transform_5(%arg0: i32) -> (i32, i32) {
    %c0_i32 = arith.constant 0 : i32
    %c0_i32_0 = arith.constant 0 : i32
    %c0_i32_1 = arith.constant 0 : i32
    return %c0_i32, %c0_i32_0 : i32, i32
  }
  func.func @transform_6(%arg0: i32) -> (i32, i32) {
    %c0_i32 = arith.constant 0 : i32
    %c0_i32_0 = arith.constant 0 : i32
    %c0_i32_1 = arith.constant 0 : i32
    return %c0_i32, %c0_i32_0 : i32, i32
  }
  func.func @transform_7(%arg0: i32) -> (i32, i32, i32) {
    %c0_i32 = arith.constant 0 : i32
    %c0_i32_0 = arith.constant 0 : i32
    %c0_i32_1 = arith.constant 0 : i32
    %c0_i32_2 = arith.constant 0 : i32
    return %c0_i32, %c0_i32_0, %c0_i32_1 : i32, i32, i32
  }
  func.func @transform_8(%arg0: i32) -> (i32, i32, i32) {
    %c0_i32 = arith.constant 0 : i32
    %c0_i32_0 = arith.constant 0 : i32
    %c0_i32_1 = arith.constant 0 : i32
    %c0_i32_2 = arith.constant 0 : i32
    return %c0_i32, %c0_i32_0, %c0_i32_1 : i32, i32, i32
  }
  func.func @transform_9(%arg0: i32) -> (i32, i32) {
    %c0_i32 = arith.constant 0 : i32
    %c0_i32_0 = arith.constant 0 : i32
    %c0_i32_1 = arith.constant 0 : i32
    return %c0_i32, %c0_i32_0 : i32, i32
  }
  func.func @transform_10(%arg0: i32) -> (i32, i32) {
    %c0_i32 = arith.constant 0 : i32
    %c0_i32_0 = arith.constant 0 : i32
    %c0_i32_1 = arith.constant 0 : i32
    return %c0_i32, %c0_i32_0 : i32, i32
  }
  func.func @transform_11(%arg0: i32) -> (i32, i32) {
    %c0_i32 = arith.constant 0 : i32
    %c0_i32_0 = arith.constant 0 : i32
    %c0_i32_1 = arith.constant 0 : i32
    return %c0_i32, %c0_i32_0 : i32, i32
  }
}

</mosaic_0001>

<bundles_post_ra>
// kernel: tpu_custom_call.1
= control target key start
LH: loop header
LB: loop body
LE: loop exit
PB: predicated region body
PF: predicated region fallthrough
CT: control target
= control target key end

     0   :  { %s3256_s0 = inlined_call_operand.vmem [shape: f32[16,8], index: 0, kind: input, shape index: {}]   ;;  %s3257_s1 = inlined_call_operand.hbm [shape: f32[8,128], index: 1, kind: input, shape index: {}]   ;;  %s3258_s2 = inlined_call_operand.vmem [shape: f32[32,128], index: 2, kind: input, shape index: {}]   ;;  %s3259_s3 = inlined_call_operand.hbm [shape: f32[1,128], index: 3, kind: input, shape index: {}]   ;;  %s3260_s4 = inlined_call_operand.vmem [shape: f32[32,128], index: 4, kind: input, shape index: {}]   ;;  %s3261_s5 = inlined_call_operand.hbm [shape: f32[32,128], index: 5, kind: input, shape index: {}]   ;;  %s3262_s6 = inlined_call_operand.vmem [shape: f32[1,128], index: 6, kind: input, shape index: {}]   ;;  %s3263_s7 = inlined_call_operand.vmem [shape: f32[2,2,32], index: 7, kind: input, shape index: {}]   ;;  %s3264_s8 = inlined_call_operand.vmem [shape: f32[2,2,32], index: 8, kind: input, shape index: {}]   ;;  %s3265_s9 = inlined_call_operand.vmem [shape: f32[32,1], index: 9, kind: input, shape index: {}]   ;;  %s3266_s10 = inlined_call_operand.<no memory space> [shape: f32[1,1], index: 10, kind: input, shape index: {}]   ;;  %s3267_s11 = inlined_call_operand.vmem [shape: f32[2,1], index: 11, kind: output, shape index: {}]  }
   0x1   :  { %v16_v0 = vstv %s3266_s10 }
   0x2   :  { %17 = vst [vmem:[#allocation6] sm:$0x1] %v16_v0 }
   0x3   :  { %18 = vsyncpa [#allocation8], 0 }
   0x4   :  { %19 = vsyncpa [#allocation10], 0  ;;  %s2766_s19 = smov [#allocation9]   ;;  %s2767_s21 = smov [#allocation7]  }
   0x5   :  { %s40_s20 = sshll.u32 %s2766_s19, 4  ;;  %s28_s22 = sshll.u32 %s2767_s21, 4  ;;  %s41_s20 = int_to_ptr.vmem [resolvable:$true] %s40_s20  ;;  %s29_s22 = int_to_ptr.vmem [resolvable:$true] %s28_s22 }
   0x6   :  { %s2696_s25 = scalar_lea.hbm %s3259_s3, 16 }
   0x7   :  { %p2697_p0 = scmp.ne.s32.totalorder %s3259_s3, %s2696_s25  ;;  %p2700_p1 = scmp.lt.u32.totalorder %s2696_s25, %s3259_s3 }
   0x9   :  { %p2702_p2 = pnand %p2700_p1, %p2697_p0 }
   0xb   :  { %2705 = shalt.err (!%p2702_p2)
}
   0xc   :  { %s2706_s10 = scalar_lea.vmem %s41_s20, 16  ;;  %s2710_s30 = scalar_lea.vmem %s41_s20, 32 }
   0xd   :  { %p2707_p3 = scmp.ne.s32.totalorder %s41_s20, %s2706_s10  ;;  %p2711_p4 = scmp.lt.s32.totalorder %s41_s20, %s41_s20 }
   0xe   :  { %p2712_p5 = scmp.lt.s32.totalorder %s2710_s30, %s2706_s10 }
  0x10   :  { %p2713_p6 = por %p2712_p5, %p2711_p4 }
  0x12   :  { %p2714_p7 = pnand %p2713_p6, %p2707_p3 }
  0x14   :  { %2717 = shalt.err (!%p2714_p7)
}
  0x15   :  { %43 = dma.hbm_to_vmem [thread:$0]  %s3259_s3, 16, %s41_s20, [#allocation10]  }
  0x16   :  { %s2718_s16 = scalar_lea.hbm %s3257_s1, 128 }
  0x17   :  { %p2719_p8 = scmp.ne.s32.totalorder %s3257_s1, %s2718_s16  ;;  %p2722_p9 = scmp.lt.u32.totalorder %s2718_s16, %s3257_s1 }
  0x19   :  { %p2724_p10 = pnand %p2722_p9, %p2719_p8 }
  0x1b   :  { %2727 = shalt.err (!%p2724_p10)
}
  0x1c   :  { %s2728_s23 = scalar_lea.vmem %s29_s22, 128  ;;  %p2733_p12 = scmp.lt.s32.totalorder %s29_s22, %s29_s22 }
  0x1d   :  { %p2729_p11 = scmp.ne.s32.totalorder %s29_s22, %s2728_s23  ;;  %p2734_p13 = scmp.lt.s32.totalorder %s2728_s23, %s2728_s23 }
  0x1f   :  { %p2735_p0 = por %p2734_p13, %p2733_p12 }
  0x21   :  { %p2736_p1 = pnand %p2735_p0, %p2729_p11 }
  0x23   :  { %2739 = shalt.err (!%p2736_p1)
}
  0x24   :  { %31 = dma.hbm_to_vmem [thread:$0]  %s3257_s1, 128, %s29_s22, [#allocation8]  }
  0x25   :  { %s2768_s24 = smov [#allocation11]   ;;  %s2740_s28 = scalar_lea.hbm %s3261_s5, 512 }
  0x26   :  { %s51_s25 = sshll.u32 %s2768_s24, 4  ;;  %p2741_p2 = scmp.ne.s32.totalorder %s3261_s5, %s2740_s28  ;;  %s52_s25 = int_to_ptr.vmem [resolvable:$true] %s51_s25 }
  0x27   :  { %p2744_p3 = scmp.lt.u32.totalorder %s2740_s28, %s3261_s5 }
  0x29   :  { %p2746_p4 = pnand %p2744_p3, %p2741_p2 }
  0x2b   :  { %2749 = shalt.err (!%p2746_p4)
}
  0x2c   :  { %s2750_s13 = scalar_lea.vmem %s52_s25, 512  ;;  %p2755_p6 = scmp.lt.s32.totalorder %s52_s25, %s52_s25 }
  0x2d   :  { %p2751_p5 = scmp.ne.s32.totalorder %s52_s25, %s2750_s13  ;;  %p2756_p7 = scmp.lt.s32.totalorder %s2750_s13, %s2750_s13 }
  0x2f   :  { %p2757_p8 = por %p2756_p7, %p2755_p6 }
  0x31   :  { %p2758_p9 = pnand %p2757_p8, %p2751_p5 }
  0x33   :  { %2761 = shalt.err (!%p2758_p9)
}
  0x34   :  { %s2769_s1 = smov 128   ;;  %s2770_s22 = smov 8  }
  0x35   :  { %57 = dma.hbm_to_vmem [thread:$0]  %s3261_s5, 512, %s52_s25, [#allocation10], %s2769_s1, %s2769_s1, %s2770_s22  }
  0x36   :  { %2762 = dma.done.wait [#allocation8], 128  }
  0x37   :  { %2763 = vsyncadd [#allocation8], 4294967168 }
  0x38   :  { %2764 = dma.done.wait [#allocation10], 528  }
  0x39   :  { %2765 = vsyncadd [#allocation10], 4294966768  ;;  %v2771_v1 = vmov 0.0|0.0   ;;  %vm2772_vm0 = vmmov 0   ;;  %v2773_v2 = vmov 0.0   ;;  %vm98_vm1 = vcmask 64512  }
  0x3a   :  { %2510 = vmatprep.subr.bf16.mxu1 %v2771_v1  ;;  %2320 = vmatprep.mubr.msk.f32.mxu1 %vm2772_vm0, %v2773_v2  ;;  %v90_v3 = vld [vmem:[#allocation7] sm:$0xff]  ;;  %vm183_vm2 = vcmask 254976   ;;  %v86_v8 = vld [vmem:[%s3258_s2 + $0x10] sm:$0xff]  ;;  %v87_v10 = vld [vmem:[%s3258_s2 + $0x18] sm:$0xff]  ;;  %vm189_vm3 = vcmask 261120   ;;  %v77_v15 = vlaneseq  ;;  %v2774_v24 = vmov 0.5  }
  0x3b   :  { %v88_v4 = vld [vmem:[%s3256_s0] sm:$0xff]  ;;  %v89_v5 = vld [vmem:[%s3256_s0 + $0x8] sm:$0xff]  ;;  %2307 = vmatprep.subr.mxu0 %v90_v3  ;;  %v2906_v12 = vpack.c.bf16 %v87_v10, %v86_v8  ;;  %s2775_s29 = smov 64   ;;  %s2776_s10 = smov 32   ;;  %vm2179_vm7 = vcmask 1024  }
  0x3c   :  { %2309 = vmatprep.mubr.msk.f32.mxu0 %vm98_vm1, %v88_v4  ;;  %v84_v6 = vld [vmem:[%s3258_s2] sm:$0xff]  ;;  %v85_v7 = vld [vmem:[%s3258_s2 + $0x8] sm:$0xff]  ;;  %2308 = vmatpush3.msra.mxu0 %v90_v3  ;;  %v78_v20 = vand.u32 127, %v77_v15  ;;  %s2777_s30 = smov 96  }
  0x3d   :  { %v2895_v9 = vpack.c.bf16 %v85_v7, %v84_v6  ;;  %v182_v11 = vld [vmem:[%s3263_s7] sm:$0x3]  ;;  %2310 = vmatmul.mubr.msk.f32.vlgmr.msra.gmra.mrb[0].mxu0 %vm98_vm1, %v89_v5  ;;  %2516 = vmatprep.subr.bf16.mxu0 %v2771_v1  ;;  %v2187_v16 = vld [vmem:[#allocation9] ss:$0 sm:$0xff] }
  0x3e   :  { %184 = vst.msk [vmem:[#allocation4] sm:$0x3] %vm183_vm2, %v182_v11  ;;  %2331 = vmatprep.mubr.msk.f32.mxu0 %vm2772_vm0, %v2773_v2  ;;  %v185_v14 = vld [vmem:[%s3264_s8] sm:$0x3]  ;;  %vm79_vm4 = vcmp.ge.s32.totalorder %v78_v20, 64  ;;  %vm80_vm5 = vcmp.lt.s32.totalorder %v78_v20, 96 }
  0x3f   :  { %2512 = vmatpush3.bf16.msra.mxu1 %v2895_v9  ;;  %2518 = vmatpush3.bf16.msra.mxu0 %v2895_v9  ;;  %186 = vst.msk [vmem:[#allocation5] sm:$0x3] %vm183_vm2, %v185_v14  ;;  %vm81_vm6 = vmand %vm79_vm4, %vm80_vm5 }
  0x40   :  { %2513 = vmatprep.subr.bf16.mxu1 %v2771_v1  ;;  %2519 = vmatprep.subr.bf16.mxu0 %v2771_v1  ;;  %v2928_v25 = vsel %vm81_vm6, 1.0, %v2774_v24  ;;  %v2931_v30 = vsel %vm81_vm6, 0.0, %v2774_v24 }
  0x43   :  { %2515 = vmatpush3.bf16.msra.mxu1 %v2906_v12  ;;  %2521 = vmatpush3.bf16.msra.mxu0 %v2906_v12 }
  0x44   :  { %2522 = vmatprep.subr.bf16.mxu1 %v2771_v1  ;;  %2528 = vmatprep.subr.bf16.mxu0 %v2771_v1 }
  0x45   :  { %v188_v13 = vld [vmem:[#allocation4] sm:$0x3] }
  0x46   :  { %2321 = vmatmul.mubr.msk.f32.vlgmr.msra.gmra.mrb[0].mxu1 %vm189_vm3, %v188_v13  ;;  %v268_v33 = vld [vmem:[#allocation5] sm:$0x3] }
  0x47   :  { %2524 = vmatpush3.bf16.msra.mxu1 %v2895_v9  ;;  %2342 = vmatprep.mubr.msk.f32.mxu1 %vm2772_vm0, %v2773_v2 }
  0x48   :  { %2525 = vmatprep.subr.bf16.mxu1 %v2771_v1 }
  0x4b   :  { %2527 = vmatpush3.bf16.msra.mxu1 %v2906_v12 }
  0x4c   :  { %2534 = vmatprep.subr.bf16.mxu1 %v2771_v1 }
 0x110   :  { %v2311_v17 = vpop.f32.mrb[0].mxu0 }
 0x111   :  { %v177_v18 = vadd.f32 %v2311_v17, %v2187_v16  ;;  %v171_v19 = vpop.f32.mrb[1].mxu0 }
 0x112   :  { %v172_v21 = vadd.f32 %v2187_v16, %v171_v19 }
 0x113   :  { %181 = vst [vmem:[#allocation3 + $0x8] sm:$0xff] %v177_v18 }
 0x114   :  { %180 = vst [vmem:[#allocation3] sm:$0xff] %v172_v21 }
 0x119   :  { %v259_v22 = vpop.f32.mrb[0].mxu1 }
 0x11a   :  { %v2322_v23 = vpop.f32.mrb[1].mxu1 }
 0x11b   :  { %v187_v26 = vld [vmem:[#allocation3] sm:$0x3]  ;;  %v301_v47 = vld [vmem:[#allocation3 + $0x2] sm:$0x3]  ;;  %v414_v6 = vld [vmem:[#allocation3 + $0x4] sm:$0x3] }
 0x11c   :  { %v263_v27 = vadd.f32 %v259_v22, %v187_v26 }
 0x11e   :  { %v264_v28 = vmul.f32 %v263_v27, %v2928_v25 }
 0x120   :  { %2632 = vtanh.f32 %v264_v28 }
 0x12a   :  { %v2633_v29 = vpop.eup %2632 }
 0x12b   :  { %v266_v31 = vmul.f32 %v2633_v29, %v2928_v25 }
 0x12d   :  { %v267_v32 = vadd.f32 %v266_v31, %v2931_v30  ;;  %v527_v31 = vld [vmem:[#allocation3 + $0x6] sm:$0x3] }
 0x12f   :  { %275 = vrot.lane.b32.xlu0 %v267_v32, %s2775_s29 }
 0x133   :  { %270 = vrot.lane.b32.xlu0 %v268_v33, %s2776_s10 }
 0x1a1   :  { %v276_v34 = vpop.permute.xlu0 %275 }
 0x1a2   :  { %v278_v35 = vmul.f32 %v276_v34, %v267_v32 }
 0x1a4   :  { %280 = vrot.lane.b32.xlu1 %v278_v35, %s2776_s10 }
 0x1a5   :  { %v271_v36 = vpop.permute.xlu0 %270 }
 0x1a6   :  { %v273_v37 = vmul.f32 %v271_v36, %v267_v32 }
 0x216   :  { %v281_v38 = vpop.permute.xlu1 %280 }
 0x217   :  { %v283_v39 = vadd.f32 %v281_v38, %v273_v37 }
 0x219   :  { %2634 = vtanh.f32 %v283_v39 }
 0x223   :  { %v2635_v40 = vpop.eup %2634 }
 0x224   :  { %286 = vrot.lane.b32.xlu1 %v2635_v40, %s2775_s29 }
 0x228   :  { %291 = vrot.lane.b32.xlu1 %v283_v39, %s2777_s30 }
 0x296   :  { %v287_v41 = vpop.permute.xlu1 %286 }
 0x297   :  { %v289_v42 = vmul.f32 %v287_v41, %v267_v32 }
 0x299   :  { %296 = vrot.lane.b32.xlu0 %v289_v42, %s2776_s10 }
 0x29a   :  { %v292_v43 = vpop.permute.xlu1 %291 }
 0x29b   :  { %294 = vst.msk [vmem:[#allocation5] sm:$0x3] %vm183_vm2, %v292_v43 }
 0x2a2   :  { %v381_v44 = vld [vmem:[#allocation5] sm:$0x3] }
 0x2a3   :  { %383 = vrot.lane.b32.xlu1 %v381_v44, %s2776_s10 }
 0x30b   :  { %v297_v45 = vpop.permute.xlu0 %296 }
 0x30c   :  { %299 = vst.msk [vmem:[#allocation4] sm:$0x3] %vm183_vm2, %v297_v45  ;;  %300 = vst.msk [vmem:[#allocation2] sm:$0x3] %vm183_vm2, %v297_v45 }
 0x313   :  { %v302_v46 = vld [vmem:[#allocation4] sm:$0x3] }
 0x314   :  { %2332 = vmatmul.mubr.msk.f32.vlgmr.msra.gmra.mrb[2].mxu0 %vm189_vm3, %v302_v46 }
 0x315   :  { %2530 = vmatpush3.bf16.msra.mxu0 %v2895_v9  ;;  %2353 = vmatprep.mubr.msk.f32.mxu0 %vm2772_vm0, %v2773_v2  ;;  %v384_v57 = vpop.permute.xlu1 %383 }
 0x316   :  { %2531 = vmatprep.subr.bf16.mxu0 %v2771_v1 }
 0x319   :  { %2533 = vmatpush3.bf16.msra.mxu0 %v2906_v12 }
 0x31a   :  { %2540 = vmatprep.subr.bf16.mxu0 %v2771_v1 }
 0x3e7   :  { %v372_v48 = vpop.f32.mrb[2].mxu0 }
 0x3e8   :  { %v376_v49 = vadd.f32 %v372_v48, %v301_v47  ;;  %v2333_v50 = vpop.f32.mrb[3].mxu0 }
 0x3ea   :  { %v377_v51 = vmul.f32 %v376_v49, %v2928_v25 }
 0x3ec   :  { %2636 = vtanh.f32 %v377_v51 }
 0x3f6   :  { %v2637_v52 = vpop.eup %2636 }
 0x3f7   :  { %v379_v53 = vmul.f32 %v2637_v52, %v2928_v25  ;;  %v640_v52 = vld [vmem:[#allocation3 + $0x8] sm:$0x3] }
 0x3f9   :  { %v380_v54 = vadd.f32 %v379_v53, %v2931_v30 }
 0x3fb   :  { %388 = vrot.lane.b32.xlu0 %v380_v54, %s2775_s29  ;;  %v386_v58 = vmul.f32 %v384_v57, %v380_v54 }
 0x46d   :  { %v389_v55 = vpop.permute.xlu0 %388 }
 0x46e   :  { %v391_v56 = vmul.f32 %v389_v55, %v380_v54 }
 0x470   :  { %393 = vrot.lane.b32.xlu0 %v391_v56, %s2776_s10 }
 0x4e2   :  { %v394_v59 = vpop.permute.xlu0 %393 }
 0x4e3   :  { %v396_v60 = vadd.f32 %v394_v59, %v386_v58 }
 0x4e5   :  { %2638 = vtanh.f32 %v396_v60 }
 0x4ef   :  { %v2639_v61 = vpop.eup %2638 }
 0x4f0   :  { %399 = vrot.lane.b32.xlu1 %v2639_v61, %s2775_s29 }
 0x4f4   :  { %404 = vrot.lane.b32.xlu1 %v396_v60, %s2777_s30 }
 0x562   :  { %v400_v62 = vpop.permute.xlu1 %399 }
 0x563   :  { %v402_v63 = vmul.f32 %v400_v62, %v380_v54 }
 0x565   :  { %409 = vrot.lane.b32.xlu0 %v402_v63, %s2776_s10 }
 0x566   :  { %v405_v0 = vpop.permute.xlu1 %404 }
 0x567   :  { %407 = vst.msk [vmem:[#allocation5] sm:$0x3] %vm183_vm2, %v405_v0 }
 0x56e   :  { %v494_v3 = vld [vmem:[#allocation5] sm:$0x3] }
 0x56f   :  { %496 = vrot.lane.b32.xlu1 %v494_v3, %s2776_s10 }
 0x5d7   :  { %v410_v4 = vpop.permute.xlu0 %409 }
 0x5d8   :  { %412 = vst.msk [vmem:[#allocation4] sm:$0x3] %vm183_vm2, %v410_v4  ;;  %413 = vst.msk [vmem:[#allocation2 + $0x2] sm:$0x3] %vm183_vm2, %v410_v4 }
 0x5df   :  { %v415_v5 = vld [vmem:[#allocation4] sm:$0x3] }
 0x5e0   :  { %2343 = vmatmul.mubr.msk.f32.vlgmr.msra.gmra.mrb[2].mxu1 %vm189_vm3, %v415_v5 }
 0x5e1   :  { %2536 = vmatpush3.bf16.msra.mxu1 %v2895_v9  ;;  %2364 = vmatprep.mubr.msk.f32.mxu1 %vm2772_vm0, %v2773_v2  ;;  %v497_v18 = vpop.permute.xlu1 %496 }
 0x5e2   :  { %2537 = vmatprep.subr.bf16.mxu1 %v2771_v1 }
 0x5e5   :  { %2539 = vmatpush3.bf16.msra.mxu1 %v2906_v12 }
 0x5e6   :  { %2546 = vmatprep.subr.bf16.mxu1 %v2771_v1 }
 0x6b3   :  { %v485_v7 = vpop.f32.mrb[2].mxu1 }
 0x6b4   :  { %v489_v8 = vadd.f32 %v485_v7, %v414_v6  ;;  %v2344_v10 = vpop.f32.mrb[3].mxu1 }
 0x6b6   :  { %v490_v11 = vmul.f32 %v489_v8, %v2928_v25 }
 0x6b8   :  { %2640 = vtanh.f32 %v490_v11 }
 0x6c2   :  { %v2641_v13 = vpop.eup %2640 }
 0x6c3   :  { %v492_v14 = vmul.f32 %v2641_v13, %v2928_v25  ;;  %v753_v13 = vld [vmem:[#allocation3 + $0xa] sm:$0x3] }
 0x6c5   :  { %v493_v15 = vadd.f32 %v492_v14, %v2931_v30 }
 0x6c7   :  { %501 = vrot.lane.b32.xlu0 %v493_v15, %s2775_s29  ;;  %v499_v19 = vmul.f32 %v497_v18, %v493_v15 }
 0x739   :  { %v502_v16 = vpop.permute.xlu0 %501 }
 0x73a   :  { %v504_v17 = vmul.f32 %v502_v16, %v493_v15 }
 0x73c   :  { %506 = vrot.lane.b32.xlu0 %v504_v17, %s2776_s10 }
 0x7ae   :  { %v507_v20 = vpop.permute.xlu0 %506 }
 0x7af   :  { %v509_v21 = vadd.f32 %v507_v20, %v499_v19 }
 0x7b1   :  { %2642 = vtanh.f32 %v509_v21 }
 0x7bb   :  { %v2643_v22 = vpop.eup %2642 }
 0x7bc   :  { %512 = vrot.lane.b32.xlu1 %v2643_v22, %s2775_s29 }
 0x7c0   :  { %517 = vrot.lane.b32.xlu1 %v509_v21, %s2777_s30 }
 0x82e   :  { %v513_v23 = vpop.permute.xlu1 %512 }
 0x82f   :  { %v515_v24 = vmul.f32 %v513_v23, %v493_v15 }
 0x831   :  { %522 = vrot.lane.b32.xlu0 %v515_v24, %s2776_s10 }
 0x832   :  { %v518_v26 = vpop.permute.xlu1 %517 }
 0x833   :  { %520 = vst.msk [vmem:[#allocation5] sm:$0x3] %vm183_vm2, %v518_v26 }
 0x83a   :  { %v607_v27 = vld [vmem:[#allocation5] sm:$0x3] }
 0x83b   :  { %609 = vrot.lane.b32.xlu1 %v607_v27, %s2776_s10 }
 0x8a3   :  { %v523_v28 = vpop.permute.xlu0 %522 }
 0x8a4   :  { %525 = vst.msk [vmem:[#allocation4] sm:$0x3] %vm183_vm2, %v523_v28  ;;  %526 = vst.msk [vmem:[#allocation2 + $0x4] sm:$0x3] %vm183_vm2, %v523_v28 }
 0x8ab   :  { %v528_v29 = vld [vmem:[#allocation4] sm:$0x3] }
 0x8ac   :  { %2354 = vmatmul.mubr.msk.f32.vlgmr.msra.gmra.mrb[4].mxu0 %vm189_vm3, %v528_v29 }
 0x8ad   :  { %2542 = vmatpush3.bf16.msra.mxu0 %v2895_v9  ;;  %2375 = vmatprep.mubr.msk.f32.mxu0 %vm2772_vm0, %v2773_v2  ;;  %v610_v41 = vpop.permute.xlu1 %609 }
 0x8ae   :  { %2543 = vmatprep.subr.bf16.mxu0 %v2771_v1 }
 0x8b1   :  { %2545 = vmatpush3.bf16.msra.mxu0 %v2906_v12 }
 0x8b2   :  { %2552 = vmatprep.subr.bf16.mxu0 %v2771_v1 }
 0x97f   :  { %v598_v32 = vpop.f32.mrb[4].mxu0 }
 0x980   :  { %v602_v33 = vadd.f32 %v598_v32, %v527_v31  ;;  %v2355_v34 = vpop.f32.mrb[5].mxu0 }
 0x982   :  { %v603_v35 = vmul.f32 %v602_v33, %v2928_v25 }
 0x984   :  { %2644 = vtanh.f32 %v603_v35  ;;  %v866_v35 = vld [vmem:[#allocation3 + $0xc] sm:$0x3] }
 0x98e   :  { %v2645_v36 = vpop.eup %2644 }
 0x98f   :  { %v605_v37 = vmul.f32 %v2645_v36, %v2928_v25 }
 0x991   :  { %v606_v38 = vadd.f32 %v605_v37, %v2931_v30 }
 0x993   :  { %614 = vrot.lane.b32.xlu0 %v606_v38, %s2775_s29  ;;  %v612_v42 = vmul.f32 %v610_v41, %v606_v38 }
 0xa05   :  { %v615_v39 = vpop.permute.xlu0 %614 }
 0xa06   :  { %v617_v40 = vmul.f32 %v615_v39, %v606_v38 }
 0xa08   :  { %619 = vrot.lane.b32.xlu0 %v617_v40, %s2776_s10 }
 0xa7a   :  { %v620_v43 = vpop.permute.xlu0 %619 }
 0xa7b   :  { %v622_v44 = vadd.f32 %v620_v43, %v612_v42 }
 0xa7d   :  { %2646 = vtanh.f32 %v622_v44 }
 0xa87   :  { %v2647_v45 = vpop.eup %2646 }
 0xa88   :  { %625 = vrot.lane.b32.xlu1 %v2647_v45, %s2775_s29 }
 0xa8c   :  { %630 = vrot.lane.b32.xlu1 %v622_v44, %s2777_s30 }
 0xafa   :  { %v626_v46 = vpop.permute.xlu1 %625 }
 0xafb   :  { %v628_v47 = vmul.f32 %v626_v46, %v606_v38 }
 0xafd   :  { %635 = vrot.lane.b32.xlu0 %v628_v47, %s2776_s10 }
 0xafe   :  { %v631_v48 = vpop.permute.xlu1 %630 }
 0xaff   :  { %633 = vst.msk [vmem:[#allocation5] sm:$0x3] %vm183_vm2, %v631_v48 }
 0xb06   :  { %v720_v49 = vld [vmem:[#allocation5] sm:$0x3] }
 0xb07   :  { %722 = vrot.lane.b32.xlu1 %v720_v49, %s2776_s10 }
 0xb6f   :  { %v636_v50 = vpop.permute.xlu0 %635 }
 0xb70   :  { %638 = vst.msk [vmem:[#allocation4] sm:$0x3] %vm183_vm2, %v636_v50  ;;  %639 = vst.msk [vmem:[#allocation2 + $0x6] sm:$0x3] %vm183_vm2, %v636_v50 }
 0xb77   :  { %v641_v51 = vld [vmem:[#allocation4] sm:$0x3] }
 0xb78   :  { %2365 = vmatmul.mubr.msk.f32.vlgmr.msra.gmra.mrb[4].mxu1 %vm189_vm3, %v641_v51  ;;  %v1096_v34 = vld [vmem:[#allocation2] sm:$0xff] }
 0xb79   :  { %2548 = vmatpush3.bf16.msra.mxu1 %v2895_v9  ;;  %2386 = vmatprep.mubr.msk.f32.mxu1 %vm2772_vm0, %v2773_v2  ;;  %v723_v62 = vpop.permute.xlu1 %722 }
 0xb7a   :  { %2549 = vmatprep.subr.bf16.mxu1 %v2771_v1 }
 0xb7d   :  { %2551 = vmatpush3.bf16.msra.mxu1 %v2906_v12 }
 0xc4b   :  { %v711_v53 = vpop.f32.mrb[4].mxu1 }
 0xc4c   :  { %v715_v54 = vadd.f32 %v711_v53, %v640_v52  ;;  %v2366_v55 = vpop.f32.mrb[5].mxu1 }
 0xc4e   :  { %v716_v56 = vmul.f32 %v715_v54, %v2928_v25 }
 0xc50   :  { %2648 = vtanh.f32 %v716_v56  ;;  %v979_v56 = vld [vmem:[#allocation3 + $0xe] sm:$0x3] }
 0xc5a   :  { %v2649_v57 = vpop.eup %2648 }
 0xc5b   :  { %v718_v58 = vmul.f32 %v2649_v57, %v2928_v25 }
 0xc5d   :  { %v719_v59 = vadd.f32 %v718_v58, %v2931_v30 }
 0xc5f   :  { %727 = vrot.lane.b32.xlu0 %v719_v59, %s2775_s29  ;;  %v725_v63 = vmul.f32 %v723_v62, %v719_v59 }
 0xcd1   :  { %v728_v60 = vpop.permute.xlu0 %727 }
 0xcd2   :  { %v730_v61 = vmul.f32 %v728_v60, %v719_v59 }
 0xcd4   :  { %732 = vrot.lane.b32.xlu0 %v730_v61, %s2776_s10 }
 0xd46   :  { %v733_v0 = vpop.permute.xlu0 %732 }
 0xd47   :  { %v735_v3 = vadd.f32 %v733_v0, %v725_v63 }
 0xd49   :  { %2650 = vtanh.f32 %v735_v3 }
 0xd53   :  { %v2651_v4 = vpop.eup %2650 }
 0xd54   :  { %738 = vrot.lane.b32.xlu1 %v2651_v4, %s2775_s29 }
 0xd58   :  { %743 = vrot.lane.b32.xlu1 %v735_v3, %s2777_s30 }
 0xdc6   :  { %v739_v5 = vpop.permute.xlu1 %738 }
 0xdc7   :  { %v741_v6 = vmul.f32 %v739_v5, %v719_v59 }
 0xdc9   :  { %748 = vrot.lane.b32.xlu0 %v741_v6, %s2776_s10 }
 0xdca   :  { %v744_v7 = vpop.permute.xlu1 %743 }
 0xdcb   :  { %746 = vst.msk [vmem:[#allocation5] sm:$0x3] %vm183_vm2, %v744_v7 }
 0xdd2   :  { %v833_v8 = vld [vmem:[#allocation5] sm:$0x3] }
 0xdd3   :  { %835 = vrot.lane.b32.xlu1 %v833_v8, %s2776_s10 }
 0xe3b   :  { %v749_v10 = vpop.permute.xlu0 %748 }
 0xe3c   :  { %751 = vst.msk [vmem:[#allocation4] sm:$0x3] %vm183_vm2, %v749_v10  ;;  %752 = vst.msk [vmem:[#allocation2 + $0x8] sm:$0x3] %vm183_vm2, %v749_v10  ;;  %v1098_v10 = vld [vmem:[%s3260_s4] sm:$0xff] }
 0xe43   :  { %v754_v11 = vld [vmem:[#allocation4] sm:$0x3] }
 0xe44   :  { %2376 = vmatmul.mubr.msk.f32.vlgmr.msra.gmra.mrb[6].mxu0 %vm189_vm3, %v754_v11  ;;  %v1099_v11 = vld [vmem:[%s3260_s4 + $0x8] sm:$0xff] }
 0xe45   :  { %2554 = vmatpush3.bf16.msra.mxu0 %v2895_v9  ;;  %2397 = vmatprep.mubr.msk.f32.mxu0 %vm2772_vm0, %v2773_v2 }
 0xe46   :  { %2555 = vmatprep.subr.bf16.mxu0 %v2771_v1 }
 0xe49   :  { %2557 = vmatpush3.bf16.msra.mxu0 %v2906_v12  ;;  %v836_v12 = vpop.permute.xlu1 %835 }
 0xe4a   :  { %2566 = vmatprep.subr.bf16.mxu0 %v2771_v1 }
 0xf17   :  { %v824_v14 = vpop.f32.mrb[6].mxu0 }
 0xf18   :  { %v828_v15 = vadd.f32 %v824_v14, %v753_v13  ;;  %v2377_v16 = vpop.f32.mrb[7].mxu0  ;;  %v2558_v13 = vpack.c.bf16 %v1099_v11, %v1098_v10  ;;  %v1100_v14 = vld [vmem:[%s3260_s4 + $0x10] sm:$0xff] }
 0xf1a   :  { %v829_v17 = vmul.f32 %v828_v15, %v2928_v25  ;;  %v1101_v15 = vld [vmem:[%s3260_s4 + $0x18] sm:$0xff]  ;;  %2559 = vmatprep.subr.bf16.mxu1 %v2558_v13 }
 0xf1b   :  { %v2562_v16 = vpack.c.bf16 %v1101_v15, %v1100_v14 }
 0xf1c   :  { %2652 = vtanh.f32 %v829_v17  ;;  %v1092_v17 = vld [vmem:[#allocation11] sm:$0xff] }
 0xf26   :  { %v2653_v18 = vpop.eup %2652 }
 0xf27   :  { %v831_v19 = vmul.f32 %v2653_v18, %v2928_v25  ;;  %v1093_v18 = vld [vmem:[#allocation11 + $0x8] sm:$0xff] }
 0xf29   :  { %v832_v9 = vadd.f32 %v831_v19, %v2931_v30  ;;  %v1094_v19 = vld [vmem:[#allocation11 + $0x10] sm:$0xff] }
 0xf2b   :  { %840 = vrot.lane.b32.xlu0 %v832_v9, %s2775_s29  ;;  %v838_v22 = vmul.f32 %v836_v12, %v832_v9 }
 0xf9d   :  { %v841_v20 = vpop.permute.xlu0 %840 }
 0xf9e   :  { %v843_v21 = vmul.f32 %v841_v20, %v832_v9  ;;  %v1095_v20 = vld [vmem:[#allocation11 + $0x18] sm:$0xff] }
 0xfa0   :  { %845 = vrot.lane.b32.xlu0 %v843_v21, %s2776_s10 }
0x1012   :  { %v846_v23 = vpop.permute.xlu0 %845 }
0x1013   :  { %v848_v24 = vadd.f32 %v846_v23, %v838_v22  ;;  %v3079_v22 = vpack.c.bf16 %v1095_v20, %v1094_v19  ;;  %v2202_v23 = vld [vmem:[%s3264_s8 + $0x2] sm:$0x3] }
0x1015   :  { %2654 = vtanh.f32 %v848_v24 }
0x101f   :  { %v2655_v26 = vpop.eup %2654 }
0x1020   :  { %851 = vrot.lane.b32.xlu1 %v2655_v26, %s2775_s29 }
0x1024   :  { %856 = vrot.lane.b32.xlu1 %v848_v24, %s2777_s30 }
0x1092   :  { %v852_v27 = vpop.permute.xlu1 %851 }
0x1093   :  { %v854_v28 = vmul.f32 %v852_v27, %v832_v9  ;;  %v3076_v9 = vpack.c.bf16 %v1093_v18, %v1092_v17  ;;  %v2201_v27 = vld [vmem:[%s3263_s7 + $0x2] sm:$0x3] }
0x1095   :  { %861 = vrot.lane.b32.xlu0 %v854_v28, %s2776_s10 }
0x1096   :  { %v857_v29 = vpop.permute.xlu1 %856 }
0x1097   :  { %859 = vst.msk [vmem:[#allocation5] sm:$0x3] %vm183_vm2, %v857_v29 }
0x109e   :  { %v946_v31 = vld [vmem:[#allocation5] sm:$0x3] }
0x109f   :  { %948 = vrot.lane.b32.xlu1 %v946_v31, %s2776_s10 }
0x1107   :  { %v862_v32 = vpop.permute.xlu0 %861 }
0x1108   :  { %864 = vst.msk [vmem:[#allocation4] sm:$0x3] %vm183_vm2, %v862_v32  ;;  %865 = vst.msk [vmem:[#allocation2 + $0xa] sm:$0x3] %vm183_vm2, %v862_v32  ;;  %v2198_v32 = vld [vmem:[%s3262_s6] ss:$0 sm:$0xff] }
0x110f   :  { %v867_v33 = vld [vmem:[#allocation4] sm:$0x3] }
0x1110   :  { %2387 = vmatmul.mubr.msk.f32.vlgmr.msra.gmra.mrb[6].mxu1 %vm189_vm3, %v867_v33 }
0x1111   :  { %2408 = vmatprep.mubr.msk.f32.mxu1 %vm189_vm3, %v1096_v34  ;;  %v949_v45 = vpop.permute.xlu1 %948  ;;  %2561 = vmatpush3.bf16.msra.mxu1 %v2558_v13 }
0x1112   :  { %2563 = vmatprep.subr.bf16.mxu1 %v2562_v16 }
0x1115   :  { %2565 = vmatpush3.bf16.msra.mxu1 %v2562_v16 }
0x1116   :  { %2572 = vmatprep.subr.bf16.mxu1 %v2771_v1 }
0x11e3   :  { %v937_v36 = vpop.f32.mrb[6].mxu1 }
0x11e4   :  { %v941_v37 = vadd.f32 %v937_v36, %v866_v35  ;;  %v2388_v38 = vpop.f32.mrb[7].mxu1 }
0x11e6   :  { %v942_v39 = vmul.f32 %v941_v37, %v2928_v25 }
0x11e8   :  { %2656 = vtanh.f32 %v942_v39 }
0x11f2   :  { %v2657_v40 = vpop.eup %2656 }
0x11f3   :  { %v944_v41 = vmul.f32 %v2657_v40, %v2928_v25 }
0x11f5   :  { %v945_v42 = vadd.f32 %v944_v41, %v2931_v30 }
0x11f7   :  { %953 = vrot.lane.b32.xlu0 %v945_v42, %s2775_s29  ;;  %v951_v46 = vmul.f32 %v949_v45, %v945_v42 }
0x1269   :  { %v954_v43 = vpop.permute.xlu0 %953 }
0x126a   :  { %v956_v44 = vmul.f32 %v954_v43, %v945_v42 }
0x126c   :  { %958 = vrot.lane.b32.xlu0 %v956_v44, %s2776_s10 }
0x12de   :  { %v959_v47 = vpop.permute.xlu0 %958 }
0x12df   :  { %v961_v48 = vadd.f32 %v959_v47, %v951_v46 }
0x12e1   :  { %2658 = vtanh.f32 %v961_v48 }
0x12eb   :  { %v2659_v49 = vpop.eup %2658 }
0x12ec   :  { %964 = vrot.lane.b32.xlu1 %v2659_v49, %s2775_s29 }
0x12f0   :  { %969 = vrot.lane.b32.xlu1 %v961_v48, %s2777_s30 }
0x135e   :  { %v965_v50 = vpop.permute.xlu1 %964 }
0x135f   :  { %v967_v51 = vmul.f32 %v965_v50, %v945_v42 }
0x1361   :  { %974 = vrot.lane.b32.xlu0 %v967_v51, %s2776_s10 }
0x1362   :  { %v970_v52 = vpop.permute.xlu1 %969 }
0x1363   :  { %972 = vst.msk [vmem:[#allocation5] sm:$0x3] %vm183_vm2, %v970_v52 }
0x136a   :  { %v1059_v53 = vld [vmem:[#allocation5] sm:$0x3] }
0x136b   :  { %1061 = vrot.lane.b32.xlu1 %v1059_v53, %s2776_s10 }
0x13d3   :  { %v975_v54 = vpop.permute.xlu0 %974 }
0x13d4   :  { %977 = vst.msk [vmem:[#allocation4] sm:$0x3] %vm183_vm2, %v975_v54  ;;  %978 = vst.msk [vmem:[#allocation2 + $0xc] sm:$0x3] %vm183_vm2, %v975_v54 }
0x13db   :  { %v980_v55 = vld [vmem:[#allocation4] sm:$0x3] }
0x13dc   :  { %2398 = vmatmul.mubr.msk.f32.vlgmr.msra.gmra.mrb[8].mxu0 %vm189_vm3, %v980_v55 }
0x13dd   :  { %2419 = vmatprep.mubr.msk.f32.mxu0 %vm2772_vm0, %v2773_v2  ;;  %v1062_v4 = vpop.permute.xlu1 %1061  ;;  %2568 = vmatpush3.bf16.msra.mxu0 %v3076_v9 }
0x13de   :  { %2569 = vmatprep.subr.bf16.mxu0 %v2771_v1 }
0x13e1   :  { %2571 = vmatpush3.bf16.msra.mxu0 %v3079_v22 }
0x13e2   :  { %2578 = vmatprep.subr.bf16.mxu0 %v2771_v1 }
0x14af   :  { %v1050_v57 = vpop.f32.mrb[8].mxu0 }
0x14b0   :  { %v1054_v58 = vadd.f32 %v1050_v57, %v979_v56  ;;  %v2399_v59 = vpop.f32.mrb[9].mxu0 }
0x14b2   :  { %v1055_v60 = vmul.f32 %v1054_v58, %v2928_v25 }
0x14b4   :  { %2660 = vtanh.f32 %v1055_v60 }
0x14be   :  { %v2661_v61 = vpop.eup %2660 }
0x14bf   :  { %v1057_v62 = vmul.f32 %v2661_v61, %v2928_v25 }
0x14c1   :  { %v1058_v63 = vadd.f32 %v1057_v62, %v2931_v30 }
0x14c3   :  { %1066 = vrot.lane.b32.xlu0 %v1058_v63, %s2775_s29  ;;  %v1064_v5 = vmul.f32 %v1062_v4, %v1058_v63 }
0x1535   :  { %v1067_v0 = vpop.permute.xlu0 %1066 }
0x1536   :  { %v1069_v3 = vmul.f32 %v1067_v0, %v1058_v63 }
0x1538   :  { %1071 = vrot.lane.b32.xlu0 %v1069_v3, %s2776_s10 }
0x15aa   :  { %v1072_v6 = vpop.permute.xlu0 %1071 }
0x15ab   :  { %v1074_v7 = vadd.f32 %v1072_v6, %v1064_v5 }
0x15ad   :  { %2662 = vtanh.f32 %v1074_v7 }
0x15b7   :  { %v2663_v8 = vpop.eup %2662 }
0x15b8   :  { %1077 = vrot.lane.b32.xlu1 %v2663_v8, %s2775_s29 }
0x15bc   :  { %1082 = vrot.lane.b32.xlu1 %v1074_v7, %s2777_s30 }
0x162a   :  { %v1078_v21 = vpop.permute.xlu1 %1077 }
0x162b   :  { %v1080_v12 = vmul.f32 %v1078_v21, %v1058_v63 }
0x162d   :  { %1087 = vrot.lane.b32.xlu0 %v1080_v12, %s2776_s10 }
0x162e   :  { %v1083_v24 = vpop.permute.xlu1 %1082 }
0x162f   :  { %1085 = vst.msk [vmem:[#allocation5] sm:$0x3] %vm183_vm2, %v1083_v24 }
0x1630   :  { %1197 = vst.msk [vmem:[#allocation5] sm:$0x3] %vm183_vm2, %v2202_v23 }
0x1637   :  { %v1278_v26 = vld [vmem:[#allocation5] sm:$0x3] }
0x1638   :  { %1280 = vrot.lane.b32.xlu1 %v1278_v26, %s2776_s10 }
0x169f   :  { %v1088_v28 = vpop.permute.xlu0 %1087 }
0x16a0   :  { %1090 = vst.msk [vmem:[#allocation4] sm:$0x3] %vm183_vm2, %v1088_v28  ;;  %1091 = vst.msk [vmem:[#allocation2 + $0xe] sm:$0x3] %vm183_vm2, %v1088_v28 }
0x16a1   :  { %1194 = vst.msk [vmem:[#allocation4] sm:$0x3] %vm183_vm2, %v2201_v27 }
0x16a7   :  { %v1097_v29 = vld [vmem:[#allocation2 + $0x8] sm:$0xff] }
0x16a8   :  { %2409 = vmatmul.mubr.msk.f32.vlgmr.msra.gmra.mrb[8].mxu1 %vm189_vm3, %v1097_v29  ;;  %v1199_v31 = vld [vmem:[#allocation4] sm:$0x3] }
0x16a9   :  { %2420 = vmatmul.mubr.msk.f32.vlgmr.msra.gmra.mrb[10].mxu0 %vm189_vm3, %v1199_v31  ;;  %2574 = vmatpush3.bf16.msra.mxu1 %v3076_v9 }
0x16aa   :  { %2575 = vmatprep.subr.bf16.mxu1 %v2771_v1  ;;  %2430 = vmatprep.mubr.msk.f32.mxu1 %vm2772_vm0, %v2773_v2  ;;  %v1281_v47 = vpop.permute.xlu1 %1280 }
0x16ab   :  { %2580 = vmatpush3.bf16.msra.mxu0 %v3076_v9  ;;  %2441 = vmatprep.mubr.msk.f32.mxu0 %vm2772_vm0, %v2773_v2 }
0x16ac   :  { %2581 = vmatprep.subr.bf16.mxu0 %v2771_v1 }
0x16ad   :  { %2577 = vmatpush3.bf16.msra.mxu1 %v3079_v22 }
0x16ae   :  { %2584 = vmatprep.subr.bf16.mxu1 %v2771_v1 }
0x16af   :  { %2583 = vmatpush3.bf16.msra.mxu0 %v3079_v22 }
0x16b0   :  { %2590 = vmatprep.subr.bf16.mxu0 %v2771_v1 }
0x177b   :  { %v2410_v33 = vpop.f32.mrb[8].mxu1 }
0x177c   :  { %v1187_v34 = vadd.f32 %v2410_v33, %v2198_v32  ;;  %v1181_v35 = vpop.f32.mrb[9].mxu1  ;;  %v1269_v36 = vpop.f32.mrb[10].mxu0 }
0x177d   :  { %v1182_v37 = vadd.f32 %v2198_v32, %v1181_v35  ;;  %v2421_v38 = vpop.f32.mrb[11].mxu0 }
0x177e   :  { %1191 = vst [vmem:[#allocation3 + $0x8] sm:$0xff] %v1187_v34 }
0x177f   :  { %1190 = vst [vmem:[#allocation3] sm:$0xff] %v1182_v37 }
0x1786   :  { %v1198_v39 = vld [vmem:[#allocation3] sm:$0x3]  ;;  %v1310_v58 = vld [vmem:[#allocation3 + $0x2] sm:$0x3]  ;;  %v1422_v19 = vld [vmem:[#allocation3 + $0x4] sm:$0x3] }
0x1787   :  { %v1273_v40 = vadd.f32 %v1269_v36, %v1198_v39 }
0x1789   :  { %v1274_v41 = vmul.f32 %v1273_v40, %v2928_v25 }
0x178b   :  { %2664 = vtanh.f32 %v1274_v41 }
0x1795   :  { %v2665_v42 = vpop.eup %2664 }
0x1796   :  { %v1276_v43 = vmul.f32 %v2665_v42, %v2928_v25  ;;  %v1534_v42 = vld [vmem:[#allocation3 + $0x6] sm:$0x3] }
0x1798   :  { %v1277_v44 = vadd.f32 %v1276_v43, %v2931_v30 }
0x179a   :  { %1285 = vrot.lane.b32.xlu0 %v1277_v44, %s2775_s29  ;;  %v1283_v48 = vmul.f32 %v1281_v47, %v1277_v44 }
0x180c   :  { %v1286_v45 = vpop.permute.xlu0 %1285 }
0x180d   :  { %v1288_v46 = vmul.f32 %v1286_v45, %v1277_v44 }
0x180f   :  { %1290 = vrot.lane.b32.xlu0 %v1288_v46, %s2776_s10 }
0x1881   :  { %v1291_v49 = vpop.permute.xlu0 %1290 }
0x1882   :  { %v1293_v50 = vadd.f32 %v1291_v49, %v1283_v48 }
0x1884   :  { %2666 = vtanh.f32 %v1293_v50 }
0x188e   :  { %v2667_v51 = vpop.eup %2666 }
0x188f   :  { %1296 = vrot.lane.b32.xlu1 %v2667_v51, %s2775_s29 }
0x1893   :  { %1301 = vrot.lane.b32.xlu1 %v1293_v50, %s2777_s30 }
0x1901   :  { %v1297_v52 = vpop.permute.xlu1 %1296 }
0x1902   :  { %v1299_v53 = vmul.f32 %v1297_v52, %v1277_v44 }
0x1904   :  { %1306 = vrot.lane.b32.xlu0 %v1299_v53, %s2776_s10 }
0x1905   :  { %v1302_v54 = vpop.permute.xlu1 %1301 }
0x1906   :  { %1304 = vst.msk [vmem:[#allocation5] sm:$0x3] %vm183_vm2, %v1302_v54 }
0x190d   :  { %v1390_v55 = vld [vmem:[#allocation5] sm:$0x3] }
0x190e   :  { %1392 = vrot.lane.b32.xlu1 %v1390_v55, %s2776_s10 }
0x1976   :  { %v1307_v56 = vpop.permute.xlu0 %1306 }
0x1977   :  { %1309 = vst.msk [vmem:[#allocation4] sm:$0x3] %vm183_vm2, %v1307_v56 }
0x197e   :  { %v1311_v57 = vld [vmem:[#allocation4] sm:$0x3] }
0x197f   :  { %2431 = vmatmul.mubr.msk.f32.vlgmr.msra.gmra.mrb[10].mxu1 %vm189_vm3, %v1311_v57 }
0x1980   :  { %2586 = vmatpush3.bf16.msra.mxu1 %v3076_v9  ;;  %2452 = vmatprep.mubr.msk.f32.mxu1 %vm2772_vm0, %v2773_v2  ;;  %v1393_v6 = vpop.permute.xlu1 %1392 }
0x1981   :  { %2587 = vmatprep.subr.bf16.mxu1 %v2771_v1 }
0x1984   :  { %2589 = vmatpush3.bf16.msra.mxu1 %v3079_v22 }
0x1985   :  { %2596 = vmatprep.subr.bf16.mxu1 %v2771_v1 }
0x1a52   :  { %v1381_v59 = vpop.f32.mrb[10].mxu1 }
0x1a53   :  { %v1385_v60 = vadd.f32 %v1381_v59, %v1310_v58  ;;  %v2432_v61 = vpop.f32.mrb[11].mxu1 }
0x1a55   :  { %v1386_v62 = vmul.f32 %v1385_v60, %v2928_v25 }
0x1a57   :  { %2668 = vtanh.f32 %v1386_v62 }
0x1a61   :  { %v2669_v63 = vpop.eup %2668 }
0x1a62   :  { %v1388_v0 = vmul.f32 %v2669_v63, %v2928_v25  ;;  %v1646_v63 = vld [vmem:[#allocation3 + $0x8] sm:$0x3] }
0x1a64   :  { %v1389_v3 = vadd.f32 %v1388_v0, %v2931_v30 }
0x1a66   :  { %1397 = vrot.lane.b32.xlu0 %v1389_v3, %s2775_s29  ;;  %v1395_v7 = vmul.f32 %v1393_v6, %v1389_v3 }
0x1ad8   :  { %v1398_v4 = vpop.permute.xlu0 %1397 }
0x1ad9   :  { %v1400_v5 = vmul.f32 %v1398_v4, %v1389_v3 }
0x1adb   :  { %1402 = vrot.lane.b32.xlu0 %v1400_v5, %s2776_s10 }
0x1b4d   :  { %v1403_v8 = vpop.permute.xlu0 %1402 }
0x1b4e   :  { %v1405_v10 = vadd.f32 %v1403_v8, %v1395_v7 }
0x1b50   :  { %2670 = vtanh.f32 %v1405_v10 }
0x1b5a   :  { %v2671_v11 = vpop.eup %2670 }
0x1b5b   :  { %1408 = vrot.lane.b32.xlu1 %v2671_v11, %s2775_s29 }
0x1b5f   :  { %1413 = vrot.lane.b32.xlu1 %v1405_v10, %s2777_s30 }
0x1bcd   :  { %v1409_v13 = vpop.permute.xlu1 %1408 }
0x1bce   :  { %v1411_v14 = vmul.f32 %v1409_v13, %v1389_v3 }
0x1bd0   :  { %1418 = vrot.lane.b32.xlu0 %v1411_v14, %s2776_s10 }
0x1bd1   :  { %v1414_v15 = vpop.permute.xlu1 %1413 }
0x1bd2   :  { %1416 = vst.msk [vmem:[#allocation5] sm:$0x3] %vm183_vm2, %v1414_v15 }
0x1bd9   :  { %v1502_v16 = vld [vmem:[#allocation5] sm:$0x3] }
0x1bda   :  { %1504 = vrot.lane.b32.xlu1 %v1502_v16, %s2776_s10 }
0x1c42   :  { %v1419_v17 = vpop.permute.xlu0 %1418 }
0x1c43   :  { %1421 = vst.msk [vmem:[#allocation4] sm:$0x3] %vm183_vm2, %v1419_v17 }
0x1c4a   :  { %v1423_v18 = vld [vmem:[#allocation4] sm:$0x3] }
0x1c4b   :  { %2442 = vmatmul.mubr.msk.f32.vlgmr.msra.gmra.mrb[12].mxu0 %vm189_vm3, %v1423_v18 }
0x1c4c   :  { %2592 = vmatpush3.bf16.msra.mxu0 %v3076_v9  ;;  %2463 = vmatprep.mubr.msk.f32.mxu0 %vm2772_vm0, %v2773_v2  ;;  %v1505_v31 = vpop.permute.xlu1 %1504 }
0x1c4d   :  { %2593 = vmatprep.subr.bf16.mxu0 %v2771_v1 }
0x1c50   :  { %2595 = vmatpush3.bf16.msra.mxu0 %v3079_v22 }
0x1c51   :  { %2602 = vmatprep.subr.bf16.mxu0 %v2771_v1 }
0x1d1e   :  { %v1493_v20 = vpop.f32.mrb[12].mxu0 }
0x1d1f   :  { %v1497_v21 = vadd.f32 %v1493_v20, %v1422_v19  ;;  %v2443_v12 = vpop.f32.mrb[13].mxu0 }
0x1d21   :  { %v1498_v23 = vmul.f32 %v1497_v21, %v2928_v25 }
0x1d23   :  { %2672 = vtanh.f32 %v1498_v23 }
0x1d2d   :  { %v2673_v24 = vpop.eup %2672 }
0x1d2e   :  { %v1500_v26 = vmul.f32 %v2673_v24, %v2928_v25  ;;  %v1758_v24 = vld [vmem:[#allocation3 + $0xa] sm:$0x3] }
0x1d30   :  { %v1501_v27 = vadd.f32 %v1500_v26, %v2931_v30 }
0x1d32   :  { %1509 = vrot.lane.b32.xlu0 %v1501_v27, %s2775_s29  ;;  %v1507_v32 = vmul.f32 %v1505_v31, %v1501_v27 }
0x1da4   :  { %v1510_v28 = vpop.permute.xlu0 %1509 }
0x1da5   :  { %v1512_v29 = vmul.f32 %v1510_v28, %v1501_v27 }
0x1da7   :  { %1514 = vrot.lane.b32.xlu0 %v1512_v29, %s2776_s10 }
0x1e19   :  { %v1515_v33 = vpop.permute.xlu0 %1514 }
0x1e1a   :  { %v1517_v34 = vadd.f32 %v1515_v33, %v1507_v32 }
0x1e1c   :  { %2674 = vtanh.f32 %v1517_v34 }
0x1e26   :  { %v2675_v35 = vpop.eup %2674 }
0x1e27   :  { %1520 = vrot.lane.b32.xlu1 %v2675_v35, %s2775_s29 }
0x1e2b   :  { %1525 = vrot.lane.b32.xlu1 %v1517_v34, %s2777_s30 }
0x1e99   :  { %v1521_v36 = vpop.permute.xlu1 %1520 }
0x1e9a   :  { %v1523_v37 = vmul.f32 %v1521_v36, %v1501_v27 }
0x1e9c   :  { %1530 = vrot.lane.b32.xlu0 %v1523_v37, %s2776_s10 }
0x1e9d   :  { %v1526_v38 = vpop.permute.xlu1 %1525 }
0x1e9e   :  { %1528 = vst.msk [vmem:[#allocation5] sm:$0x3] %vm183_vm2, %v1526_v38 }
0x1ea5   :  { %v1614_v39 = vld [vmem:[#allocation5] sm:$0x3] }
0x1ea6   :  { %1616 = vrot.lane.b32.xlu1 %v1614_v39, %s2776_s10 }
0x1f0e   :  { %v1531_v40 = vpop.permute.xlu0 %1530 }
0x1f0f   :  { %1533 = vst.msk [vmem:[#allocation4] sm:$0x3] %vm183_vm2, %v1531_v40 }
0x1f16   :  { %v1535_v41 = vld [vmem:[#allocation4] sm:$0x3] }
0x1f17   :  { %2453 = vmatmul.mubr.msk.f32.vlgmr.msra.gmra.mrb[12].mxu1 %vm189_vm3, %v1535_v41 }
0x1f18   :  { %2598 = vmatpush3.bf16.msra.mxu1 %v3076_v9  ;;  %2474 = vmatprep.mubr.msk.f32.mxu1 %vm2772_vm0, %v2773_v2  ;;  %v1617_v52 = vpop.permute.xlu1 %1616 }
0x1f19   :  { %2599 = vmatprep.subr.bf16.mxu1 %v2771_v1 }
0x1f1c   :  { %2601 = vmatpush3.bf16.msra.mxu1 %v3079_v22 }
0x1f1d   :  { %2608 = vmatprep.subr.bf16.mxu1 %v2771_v1 }
0x1fea   :  { %v1605_v43 = vpop.f32.mrb[12].mxu1 }
0x1feb   :  { %v1609_v44 = vadd.f32 %v1605_v43, %v1534_v42  ;;  %v2454_v45 = vpop.f32.mrb[13].mxu1 }
0x1fec   :  { %v1870_v45 = vld [vmem:[#allocation3 + $0xc] sm:$0x3] }
0x1fed   :  { %v1610_v46 = vmul.f32 %v1609_v44, %v2928_v25 }
0x1fef   :  { %2676 = vtanh.f32 %v1610_v46 }
0x1ff9   :  { %v2677_v47 = vpop.eup %2676 }
0x1ffa   :  { %v1612_v48 = vmul.f32 %v2677_v47, %v2928_v25 }
0x1ffc   :  { %v1613_v49 = vadd.f32 %v1612_v48, %v2931_v30 }
0x1ffe   :  { %1621 = vrot.lane.b32.xlu0 %v1613_v49, %s2775_s29  ;;  %v1619_v53 = vmul.f32 %v1617_v52, %v1613_v49 }
0x2070   :  { %v1622_v50 = vpop.permute.xlu0 %1621 }
0x2071   :  { %v1624_v51 = vmul.f32 %v1622_v50, %v1613_v49 }
0x2073   :  { %1626 = vrot.lane.b32.xlu0 %v1624_v51, %s2776_s10 }
0x20e5   :  { %v1627_v54 = vpop.permute.xlu0 %1626 }
0x20e6   :  { %v1629_v55 = vadd.f32 %v1627_v54, %v1619_v53 }
0x20e8   :  { %2678 = vtanh.f32 %v1629_v55 }
0x20f2   :  { %v2679_v56 = vpop.eup %2678 }
0x20f3   :  { %1632 = vrot.lane.b32.xlu1 %v2679_v56, %s2775_s29 }
0x20f7   :  { %1637 = vrot.lane.b32.xlu1 %v1629_v55, %s2777_s30 }
0x2165   :  { %v1633_v57 = vpop.permute.xlu1 %1632 }
0x2166   :  { %v1635_v58 = vmul.f32 %v1633_v57, %v1613_v49 }
0x2168   :  { %1642 = vrot.lane.b32.xlu0 %v1635_v58, %s2776_s10 }
0x2169   :  { %v1638_v59 = vpop.permute.xlu1 %1637 }
0x216a   :  { %1640 = vst.msk [vmem:[#allocation5] sm:$0x3] %vm183_vm2, %v1638_v59 }
0x2171   :  { %v1726_v60 = vld [vmem:[#allocation5] sm:$0x3] }
0x2172   :  { %1728 = vrot.lane.b32.xlu1 %v1726_v60, %s2776_s10 }
0x21da   :  { %v1643_v61 = vpop.permute.xlu0 %1642 }
0x21db   :  { %1645 = vst.msk [vmem:[#allocation4] sm:$0x3] %vm183_vm2, %v1643_v61 }
0x21e2   :  { %v1647_v62 = vld [vmem:[#allocation4] sm:$0x3] }
0x21e3   :  { %2464 = vmatmul.mubr.msk.f32.vlgmr.msra.gmra.mrb[14].mxu0 %vm189_vm3, %v1647_v62 }
0x21e4   :  { %2604 = vmatpush3.bf16.msra.mxu0 %v3076_v9  ;;  %2485 = vmatprep.mubr.msk.f32.mxu0 %vm2772_vm0, %v2773_v2  ;;  %v1729_v13 = vpop.permute.xlu1 %1728 }
0x21e5   :  { %2605 = vmatprep.subr.bf16.mxu0 %v2771_v1 }
0x21e8   :  { %2607 = vmatpush3.bf16.msra.mxu0 %v3079_v22 }
0x21e9   :  { %2614 = vmatprep.subr.bf16.mxu0 %v2771_v1 }
0x22b6   :  { %v1717_v0 = vpop.f32.mrb[14].mxu0 }
0x22b7   :  { %v1721_v3 = vadd.f32 %v1717_v0, %v1646_v63  ;;  %v2465_v4 = vpop.f32.mrb[15].mxu0 }
0x22b9   :  { %v1722_v5 = vmul.f32 %v1721_v3, %v2928_v25  ;;  %v1982_v3 = vld [vmem:[#allocation3 + $0xe] sm:$0x3] }
0x22bb   :  { %2680 = vtanh.f32 %v1722_v5 }
0x22c5   :  { %v2681_v6 = vpop.eup %2680 }
0x22c6   :  { %v1724_v7 = vmul.f32 %v2681_v6, %v2928_v25 }
0x22c8   :  { %v1725_v8 = vadd.f32 %v1724_v7, %v2931_v30 }
0x22ca   :  { %1733 = vrot.lane.b32.xlu0 %v1725_v8, %s2775_s29  ;;  %v1731_v14 = vmul.f32 %v1729_v13, %v1725_v8 }
0x233c   :  { %v1734_v10 = vpop.permute.xlu0 %1733 }
0x233d   :  { %v1736_v11 = vmul.f32 %v1734_v10, %v1725_v8 }
0x233f   :  { %1738 = vrot.lane.b32.xlu0 %v1736_v11, %s2776_s10 }
0x23b1   :  { %v1739_v15 = vpop.permute.xlu0 %1738 }
0x23b2   :  { %v1741_v16 = vadd.f32 %v1739_v15, %v1731_v14 }
0x23b4   :  { %2682 = vtanh.f32 %v1741_v16 }
0x23be   :  { %v2683_v17 = vpop.eup %2682 }
0x23bf   :  { %1744 = vrot.lane.b32.xlu1 %v2683_v17, %s2775_s29 }
0x23c3   :  { %1749 = vrot.lane.b32.xlu1 %v1741_v16, %s2777_s30 }
0x2431   :  { %v1745_v18 = vpop.permute.xlu1 %1744 }
0x2432   :  { %v1747_v19 = vmul.f32 %v1745_v18, %v1725_v8 }
0x2434   :  { %1754 = vrot.lane.b32.xlu0 %v1747_v19, %s2776_s10 }
0x2435   :  { %v1750_v20 = vpop.permute.xlu1 %1749 }
0x2436   :  { %1752 = vst.msk [vmem:[#allocation5] sm:$0x3] %vm183_vm2, %v1750_v20  ;;  %v2097_v20 = vld [vmem:[%s3265_s9 + $0x10] sm:$0xff] }
0x243d   :  { %v1838_v21 = vld [vmem:[#allocation5] sm:$0x3] }
0x243e   :  { %1840 = vrot.lane.b32.xlu1 %v1838_v21, %s2776_s10 }
0x24a6   :  { %v1755_v12 = vpop.permute.xlu0 %1754 }
0x24a7   :  { %1757 = vst.msk [vmem:[#allocation4] sm:$0x3] %vm183_vm2, %v1755_v12  ;;  %v2098_v12 = vld [vmem:[%s3265_s9 + $0x18] sm:$0xff] }
0x24ae   :  { %v1759_v23 = vld [vmem:[#allocation4] sm:$0x3] }
0x24af   :  { %2475 = vmatmul.mubr.msk.f32.vlgmr.msra.gmra.mrb[14].mxu1 %vm189_vm3, %v1759_v23  ;;  %v2618_v23 = vpack.c.bf16 %v2098_v12, %v2097_v20 }
0x24b0   :  { %2610 = vmatpush3.bf16.msra.mxu1 %v3076_v9  ;;  %2496 = vmatprep.mubr.msk.f32.mxu1 %vm2772_vm0, %v2773_v2  ;;  %v1841_v35 = vpop.permute.xlu1 %1840 }
0x24b1   :  { %2611 = vmatprep.subr.bf16.mxu1 %v2771_v1 }
0x24b4   :  { %2613 = vmatpush3.bf16.msra.mxu1 %v3079_v22 }
0x2582   :  { %v1829_v26 = vpop.f32.mrb[14].mxu1 }
0x2583   :  { %v1833_v27 = vadd.f32 %v1829_v26, %v1758_v24  ;;  %v2476_v28 = vpop.f32.mrb[15].mxu1 }
0x2585   :  { %v1834_v29 = vmul.f32 %v1833_v27, %v2928_v25 }
0x2587   :  { %2684 = vtanh.f32 %v1834_v29 }
0x2591   :  { %v2685_v31 = vpop.eup %2684 }
0x2592   :  { %v1836_v32 = vmul.f32 %v2685_v31, %v2928_v25  ;;  %v2211_v31 = vld [vmem:[#allocation6] ss:$0 sm:$0xff] }
0x2594   :  { %v1837_v33 = vadd.f32 %v1836_v32, %v2931_v30 }
0x2596   :  { %1845 = vrot.lane.b32.xlu0 %v1837_v33, %s2775_s29  ;;  %v1843_v22 = vmul.f32 %v1841_v35, %v1837_v33 }
0x2608   :  { %v1846_v9 = vpop.permute.xlu0 %1845 }
0x2609   :  { %v1848_v34 = vmul.f32 %v1846_v9, %v1837_v33 }
0x260b   :  { %1850 = vrot.lane.b32.xlu0 %v1848_v34, %s2776_s10 }
0x267d   :  { %v1851_v36 = vpop.permute.xlu0 %1850 }
0x267e   :  { %v1853_v37 = vadd.f32 %v1851_v36, %v1843_v22 }
0x2680   :  { %2686 = vtanh.f32 %v1853_v37 }
0x268a   :  { %v2687_v38 = vpop.eup %2686 }
0x268b   :  { %1856 = vrot.lane.b32.xlu1 %v2687_v38, %s2775_s29 }
0x268f   :  { %1861 = vrot.lane.b32.xlu1 %v1853_v37, %s2777_s30 }
0x26fd   :  { %v1857_v39 = vpop.permute.xlu1 %1856 }
0x26fe   :  { %v1859_v40 = vmul.f32 %v1857_v39, %v1837_v33 }
0x2700   :  { %1866 = vrot.lane.b32.xlu0 %v1859_v40, %s2776_s10 }
0x2701   :  { %v1862_v41 = vpop.permute.xlu1 %1861 }
0x2702   :  { %1864 = vst.msk [vmem:[#allocation5] sm:$0x3] %vm183_vm2, %v1862_v41 }
0x2709   :  { %v1950_v42 = vld [vmem:[#allocation5] sm:$0x3] }
0x270a   :  { %1952 = vrot.lane.b32.xlu1 %v1950_v42, %s2776_s10 }
0x2772   :  { %v1867_v43 = vpop.permute.xlu0 %1866 }
0x2773   :  { %1869 = vst.msk [vmem:[#allocation4] sm:$0x3] %vm183_vm2, %v1867_v43 }
0x277a   :  { %v1871_v44 = vld [vmem:[#allocation4] sm:$0x3] }
0x277b   :  { %2486 = vmatmul.mubr.msk.f32.vlgmr.msra.gmra.mrb[16].mxu0 %vm189_vm3, %v1871_v44 }
0x277c   :  { %2507 = vmatprep.mubr.msk.f32.mxu0 %vm2772_vm0, %v2773_v2  ;;  %v1953_v55 = vpop.permute.xlu1 %1952 }
0x284e   :  { %v1941_v46 = vpop.f32.mrb[16].mxu0 }
0x284f   :  { %v1945_v47 = vadd.f32 %v1941_v46, %v1870_v45  ;;  %v2487_v48 = vpop.f32.mrb[17].mxu0 }
0x2851   :  { %v1946_v49 = vmul.f32 %v1945_v47, %v2928_v25 }
0x2853   :  { %2688 = vtanh.f32 %v1946_v49 }
0x285d   :  { %v2689_v50 = vpop.eup %2688 }
0x285e   :  { %v1948_v51 = vmul.f32 %v2689_v50, %v2928_v25 }
0x2860   :  { %v1949_v52 = vadd.f32 %v1948_v51, %v2931_v30 }
0x2862   :  { %1957 = vrot.lane.b32.xlu0 %v1949_v52, %s2775_s29  ;;  %v1955_v2 = vmul.f32 %v1953_v55, %v1949_v52 }
0x28d4   :  { %v1958_v53 = vpop.permute.xlu0 %1957 }
0x28d5   :  { %v1960_v54 = vmul.f32 %v1958_v53, %v1949_v52 }
0x28d7   :  { %1962 = vrot.lane.b32.xlu0 %v1960_v54, %s2776_s10 }
0x2949   :  { %v1963_v56 = vpop.permute.xlu0 %1962 }
0x294a   :  { %v1965_v57 = vadd.f32 %v1963_v56, %v1955_v2 }
0x294c   :  { %2690 = vtanh.f32 %v1965_v57 }
0x2956   :  { %v2691_v58 = vpop.eup %2690 }
0x2957   :  { %1968 = vrot.lane.b32.xlu1 %v2691_v58, %s2775_s29 }
0x295b   :  { %1973 = vrot.lane.b32.xlu1 %v1965_v57, %s2777_s30 }
0x29c9   :  { %v1969_v59 = vpop.permute.xlu1 %1968 }
0x29ca   :  { %v1971_v60 = vmul.f32 %v1969_v59, %v1949_v52 }
0x29cc   :  { %1978 = vrot.lane.b32.xlu0 %v1971_v60, %s2776_s10 }
0x29cd   :  { %v1974_v61 = vpop.permute.xlu1 %1973 }
0x29ce   :  { %1976 = vst.msk [vmem:[#allocation5] sm:$0x3] %vm183_vm2, %v1974_v61 }
0x29d5   :  { %v2062_v62 = vld [vmem:[#allocation5] sm:$0x3] }
0x29d6   :  { %2064 = vrot.lane.b32.xlu1 %v2062_v62, %s2776_s10 }
0x2a3e   :  { %v1979_v63 = vpop.permute.xlu0 %1978 }
0x2a3f   :  { %1981 = vst.msk [vmem:[#allocation4] sm:$0x3] %vm183_vm2, %v1979_v63 }
0x2a46   :  { %v1983_v0 = vld [vmem:[#allocation4] sm:$0x3] }
0x2a47   :  { %2497 = vmatmul.mubr.msk.f32.vlgmr.msra.gmra.mrb[16].mxu1 %vm189_vm3, %v1983_v0 }
0x2a48   :  { %v2065_v15 = vpop.permute.xlu1 %2064 }
0x2b1a   :  { %v2053_v4 = vpop.f32.mrb[16].mxu1 }
0x2b1b   :  { %v2057_v5 = vadd.f32 %v2053_v4, %v1982_v3  ;;  %v2498_v6 = vpop.f32.mrb[17].mxu1 }
0x2b1d   :  { %v2058_v7 = vmul.f32 %v2057_v5, %v2928_v25 }
0x2b1f   :  { %2692 = vtanh.f32 %v2058_v7 }
0x2b29   :  { %v2693_v8 = vpop.eup %2692 }
0x2b2a   :  { %v2060_v10 = vmul.f32 %v2693_v8, %v2928_v25  ;;  %v2095_v25 = vld [vmem:[%s3265_s9] sm:$0xff] }
0x2b2c   :  { %v2061_v11 = vadd.f32 %v2060_v10, %v2931_v30  ;;  %v2096_v30 = vld [vmem:[%s3265_s9 + $0x8] sm:$0xff] }
0x2b2d   :  { %v2615_v21 = vpack.c.bf16 %v2096_v30, %v2095_v25 }
0x2b2e   :  { %2069 = vrot.lane.b32.xlu0 %v2061_v11, %s2775_s29  ;;  %v2067_v16 = vmul.f32 %v2065_v15, %v2061_v11 }
0x2b2f   :  { %2616 = vmatpush3.bf16.msra.mxu0 %v2615_v21 }
0x2b30   :  { %2617 = vmatprep.subr.bf16.mxu0 %v2771_v1 }
0x2b33   :  { %2619 = vmatpush3.bf16.msra.mxu0 %v2618_v23 }
0x2ba0   :  { %v2070_v13 = vpop.permute.xlu0 %2069 }
0x2ba1   :  { %v2072_v14 = vmul.f32 %v2070_v13, %v2061_v11 }
0x2ba3   :  { %2074 = vrot.lane.b32.xlu0 %v2072_v14, %s2776_s10 }
0x2c15   :  { %v2075_v17 = vpop.permute.xlu0 %2074 }
0x2c16   :  { %v2077_v18 = vadd.f32 %v2075_v17, %v2067_v16 }
0x2c18   :  { %2694 = vtanh.f32 %v2077_v18 }
0x2c22   :  { %v2695_v19 = vpop.eup %2694 }
0x2c23   :  { %2080 = vrot.lane.b32.xlu1 %v2695_v19, %s2775_s29 }
0x2c27   :  { %2085 = vrot.lane.b32.xlu1 %v2077_v18, %s2777_s30 }
0x2c95   :  { %v2081_v24 = vpop.permute.xlu1 %2080 }
0x2c96   :  { %v2083_v26 = vmul.f32 %v2081_v24, %v2061_v11 }
0x2c98   :  { %2090 = vrot.lane.b32.xlu0 %v2083_v26, %s2776_s10 }
0x2c99   :  { %v2086_v27 = vpop.permute.xlu1 %2085 }
0x2c9a   :  { %2088 = vst.msk [vmem:[#allocation5] sm:$0x3] %vm183_vm2, %v2086_v27 }
0x2d0a   :  { %v2091_v28 = vpop.permute.xlu0 %2090 }
0x2d0b   :  { %2093 = vst.msk [vmem:[#allocation4] sm:$0x3] %vm183_vm2, %v2091_v28 }
0x2d12   :  { %v2094_v29 = vld [vmem:[#allocation4] sm:$0x3] }
0x2d13   :  { %2508 = vmatmul.mubr.msk.f32.vlgmr.msra.gmra.mrb[18].mxu0 %vm189_vm3, %v2094_v29 }
0x2de6   :  { %v2175_v32 = vpop.f32.mrb[18].mxu0 }
0x2de7   :  { %v2176_v33 = vadd.f32 %v2211_v31, %v2175_v32  ;;  %v2509_v9 = vpop.f32.mrb[19].mxu0 }
0x2de9   :  { %2180 = vst.msk [vmem:[%s3267_s11] sm:$0x3] %vm2179_vm7, %v2176_v33 }
0x2dea   :  { %2185 = vsyncpa [#allocation8], 1 }
0x2deb   :  { %2186 = vsyncpa [#allocation10], 1 }

</bundles_post_ra>
